<compile_context>
chip_gen: v6e
topology: v6e:2x2x1
jax: 0.10.0
libtpu: 0.0.40
codegen_flags: <defaults>
</compile_context>

<pallas_src>
import functools

import numpy as np
import jax
import jax.numpy as jnp
from jax.experimental import pallas as pl
from jax.experimental.pallas import tpu as pltpu


def inception_aux_kernel(a_ref, w0_ref, b0_ref, w1_ref, b1_ref, wfc_hbm,
                         bfc_ref, o_ref, wfc_vmem, wfc_sem):
    np_rows = o_ref.shape[0]          # padded batch, multiple of 8 (static)
    n_tap = 9                         # 3x3 receptive field of conv1 = 9 pooled taps

    # Kick off the fc-weight DMA now; it overlaps with conv0/conv1 below and is only
    # waited on right before the fc matmul.
    wfc_cp = pltpu.make_async_copy(wfc_hbm, wfc_vmem, wfc_sem)
    wfc_cp.start()

    # conv0 (1x1) with avg_pool2d(2,2) and the BN(eval) scale folded into the weights:
    # one (9*Np, 4*Cin) @ (4*Cin, 128) matmul.  Only the additive BN shift remains.
    h0 = jnp.dot(a_ref[...], w0_ref[...], preferred_element_type=jnp.float32)
    h0 = jnp.maximum(h0 + b0_ref[...], 0.0)                      # (9*Np, 128) f32

    # Gather the 9 tap blocks onto the lane axis: rows are tap-major (p*Np + n) and Np
    # is a multiple of 8, so every slice is whole aligned vregs and the lane offsets are
    # 128-aligned -> a pure register-level relayout, no VMEM round-trip.
    h0cat = jnp.concatenate(
        [h0[p * np_rows:(p + 1) * np_rows, :] for p in range(n_tap)], axis=1)
    h0cat = h0cat.astype(jnp.bfloat16)                           # (Np, 1152)

    # conv1 (3x3, VALID, 1x1 spatial output) + BN + ReLU as one matmul, K = 9*128.
    h1 = jnp.dot(h0cat, w1_ref[...], preferred_element_type=jnp.float32)
    h1 = jnp.maximum(h1 + b1_ref[...], 0.0).astype(jnp.bfloat16)  # (Np, 768)

    # fc (lane-padded class axis): wait for the overlapped weight DMA only here.
    wfc_cp.wait()
    o_ref[...] = jnp.dot(h1, wfc_vmem[...],
                         preferred_element_type=jnp.float32) + bfc_ref[...]


def prepare_aux_params(params):
    """One-time (model-load) weight prep: BN-eval fold, avg-pool fold, relayout, bf16.

    Cache the result and reuse it for every forward call — do NOT recompute per call.
    """
    (w0, g0, be0, m0, v0, w1, g1, be1, m1, v1, wfc, bfc) = params
    eps = 1e-3  # BasicConv2d BatchNorm2d eps
    C = w0.shape[1]

    inv0 = g0 / jnp.sqrt(v0 + eps)                                # (128,)
    inv1 = g1 / jnp.sqrt(v1 + eps)                                # (768,)

    # conv0 1x1: fold BN scale into columns and avg_pool2d(2,2) (x0.25, 4 taps on K).
    w0_mat = jnp.transpose(w0.reshape(128, C)) * inv0[None, :]    # (C, 128)
    w0_k = (0.25 * jnp.tile(w0_mat, (4, 1))).astype(jnp.bfloat16)  # (4*C, 128)
    b0_k = (be0 - m0 * inv0).reshape(1, 128).astype(jnp.float32)

    # conv1 (O=768, I=128, 3, 3) -> (9*128, 768); row = (kh*3+kw)*128 + ci (= tap-major).
    w1_k = (jnp.transpose(w1, (2, 3, 1, 0)).reshape(9 * 128, 768)
            * inv1[None, :]).astype(jnp.bfloat16)                 # (1152, 768)
    b1_k = (be1 - m1 * inv1).reshape(1, 768).astype(jnp.float32)

    # fc: pad class axis to a lane-dense multiple of 128 (sliced back after the call).
    nc = wfc.shape[0]
    ncp = ((nc + 127) // 128) * 128
    wfc_k = jnp.pad(jnp.transpose(wfc), ((0, 0), (0, ncp - nc))).astype(jnp.bfloat16)
    bfc_k = jnp.pad(bfc, (0, ncp - nc)).reshape(1, ncp).astype(jnp.float32)

    return (w0_k, b0_k, w1_k, b1_k, wfc_k, bfc_k)


@functools.partial(jax.jit, static_argnames=("num_classes",))
def inception_aux_forward(x, kparams, *, num_classes):
    """x: (N, Cin, 6, 6) NCHW float32 — exactly what the PyTorch module expects.

    kparams: output of prepare_aux_params (cached at model-load time).
    """
    w0_k, b0_k, w1_k, b1_k, wfc_k, bfc_k = kparams
    N, C, H, W = x.shape
    assert H == 6 and W == 6, "fc(768) requires 1x1 spatial after conv1 => 6x6 input"
    Np = ((N + 7) // 8) * 8          # pad batch to a sublane multiple (unmasked stores)
    ncp = wfc_k.shape[1]

    # ---- per-call host-side layout glue only (cheap; the weights are pre-folded) ----
    # Activation slab: row = p*Np + n (tap-major, p = oh*3+ow), col = q*C + c
    # (q = ih*2+iw, the avg-pool window tap stacked onto K).
    xp = jnp.pad(x, ((0, Np - N), (0, 0), (0, 0), (0, 0)))
    x_nhwc = jnp.transpose(xp, (0, 2, 3, 1))                      # (Np, 6, 6, C)
    x6 = x_nhwc.reshape(Np, 3, 2, 3, 2, C)                        # (Np, oh, ih, ow, iw, C)
    a = jnp.transpose(x6, (1, 3, 0, 2, 4, 5)).reshape(9 * Np, 4 * C)
    a = a.astype(jnp.bfloat16)

    flops = 2 * Np * (9 * (4 * C) * 128 + 1152 * 768 + 768 * ncp)
    bytes_accessed = (a.size * 2 + w0_k.size * 2 + w1_k.size * 2 + wfc_k.size * 2
                      + (128 + 768 + ncp) * 4 + Np * ncp * 4)

    vmem = pl.BlockSpec(memory_space=pltpu.MemorySpace.VMEM)
    out = pl.pallas_call(
        inception_aux_kernel,
        out_shape=jax.ShapeDtypeStruct((Np, ncp), jnp.float32),
        in_specs=[vmem, vmem, vmem, vmem, vmem,
                  pl.BlockSpec(memory_space=pl.ANY),   # wfc: manual, overlapped DMA
                  vmem],
        out_specs=vmem,
        scratch_shapes=[pltpu.VMEM((768, ncp), jnp.bfloat16),
                        pltpu.SemaphoreType.DMA],
        cost_estimate=pl.CostEstimate(flops=flops, transcendentals=0,
                                      bytes_accessed=bytes_accessed),
    )(a, w0_k, b0_k, w1_k, b1_k, wfc_k, bfc_k)
    return out[:N, :num_classes]


def reference_forward(x, params):
    """Pure-JAX mirror of the PyTorch forward (eval-mode BN), NCHW throughout."""
    (w0, g0, be0, m0, v0, w1, g1, be1, m1, v1, wfc, bfc) = params
    eps = 1e-3
    N, C, H, W = x.shape
    xp = x.reshape(N, C, H // 2, 2, W // 2, 2).mean(axis=(3, 5))    # avg_pool2d(2,2)

    def bn_relu(h, g, be, m, v):
        g = g[None, :, None, None]; be = be[None, :, None, None]
        m = m[None, :, None, None]; v = v[None, :, None, None]
        return jnp.maximum((h - m) / jnp.sqrt(v + eps) * g + be, 0.0)

    dn = ('NCHW', 'OIHW', 'NCHW')
    hi = jax.lax.Precision.HIGHEST
    h0 = jax.lax.conv_general_dilated(xp, w0, (1, 1), 'VALID',
                                      dimension_numbers=dn, precision=hi)
    h0 = bn_relu(h0, g0, be0, m0, v0)
    h1 = jax.lax.conv_general_dilated(h0, w1, (1, 1), 'VALID',
                                      dimension_numbers=dn, precision=hi)
    h1 = bn_relu(h1, g1, be1, m1, v1)
    flat = h1.reshape(N, -1)                                        # (N, 768)
    return jnp.dot(flat, wfc.T, precision=hi) + bfc[None, :]


if __name__ == "__main__":
    # small shapes consistent with the module: 6x6 spatial is forced by fc(768)
    N, Cin, H, W = 2, 4, 6, 6
    num_classes = 32  # synthetic (module default is 2350); kept small

    key = jax.random.PRNGKey(0)
    ks = jax.random.split(key, 13)
    # deterministic synthetic parameters (shapes from InceptionAux.__init__)
    w0 = 0.10 * jax.random.normal(ks[0], (128, Cin, 1, 1), jnp.float32)   # conv0 weight
    g0 = 1.0 + 0.1 * jax.random.normal(ks[1], (128,), jnp.float32)        # bn0 gamma
    be0 = 0.1 * jax.random.normal(ks[2], (128,), jnp.float32)             # bn0 beta
    m0 = 0.05 * jax.random.normal(ks[3], (128,), jnp.float32)             # bn0 running_mean
    v0 = jax.random.uniform(ks[4], (128,), jnp.float32, 0.5, 1.5)         # bn0 running_var
    w1 = 0.05 * jax.random.normal(ks[5], (768, 128, 3, 3), jnp.float32)   # conv1 weight
    g1 = 1.0 + 0.1 * jax.random.normal(ks[6], (768,), jnp.float32)
    be1 = 0.1 * jax.random.normal(ks[7], (768,), jnp.float32)
    m1 = 0.05 * jax.random.normal(ks[8], (768,), jnp.float32)
    v1 = jax.random.uniform(ks[9], (768,), jnp.float32, 0.5, 1.5)
    wfc = 0.03 * jax.random.normal(ks[10], (num_classes, 768), jnp.float32)
    bfc = 0.01 * jax.random.normal(ks[11], (num_classes,), jnp.float32)
    params = (w0, g0, be0, m0, v0, w1, g1, be1, m1, v1, wfc, bfc)

    x = jax.random.normal(ks[12], (N, Cin, H, W), jnp.float32)

    # One-time model-load prep; cached and reused by every forward call.
    kparams = prepare_aux_params(params)
    kparams = jax.tree_util.tree_map(jax.block_until_ready, kparams)

    out = jax.block_until_ready(
        inception_aux_forward(x, kparams, num_classes=num_classes))
    ref = jax.block_until_ready(reference_forward(x, params))

    assert out.shape == (N, num_classes)
    # bf16 matmul operands (f32 accumulation) -> slightly looser tolerance than f32
    np.testing.assert_allclose(np.asarray(out), np.asarray(ref), rtol=2e-2, atol=1e-2)
    print("KERNEL_OK")
</pallas_src>

<mosaic_0001>
module attributes {stable_mosaic.version = 11 : i64} {
  func.func @inception_aux_kernel(%arg0: memref<72x16xbf16, #tpu.memory_space<vmem>>, %arg1: memref<16x128xbf16, #tpu.memory_space<vmem>>, %arg2: memref<1x128xf32, #tpu.memory_space<vmem>>, %arg3: memref<1152x768xbf16, #tpu.memory_space<vmem>>, %arg4: memref<1x768xf32, #tpu.memory_space<vmem>>, %arg5: memref<768x128xbf16, #tpu.memory_space<any>>, %arg6: memref<1x128xf32, #tpu.memory_space<vmem>>, %arg7: memref<8x128xf32, #tpu.memory_space<vmem>>, %arg8: memref<768x128xbf16, #tpu.memory_space<vmem>>, %arg9: memref<!tpu.dma_semaphore, #tpu.memory_space<semaphore_mem>>) attributes {dimension_semantics = [], scalar_prefetch = 0 : i64, scratch_operands = 2 : i64, tpu.core_type = #tpu.core_type<tc>} {
    tpu.enqueue_dma source(%arg5 : memref<768x128xbf16, #tpu.memory_space<any>>) target(%arg8 : memref<768x128xbf16, #tpu.memory_space<vmem>>) target_semaphore(%arg9 : memref<!tpu.dma_semaphore, #tpu.memory_space<semaphore_mem>>)
    %c0 = arith.constant 0 : index
    %c0_0 = arith.constant 0 : index
    %0 = vector.load %arg0[%c0, %c0_0] : memref<72x16xbf16, #tpu.memory_space<vmem>>, vector<72x16xbf16>
    %c0_1 = arith.constant 0 : index
    %c0_2 = arith.constant 0 : index
    %1 = vector.load %arg1[%c0_1, %c0_2] : memref<16x128xbf16, #tpu.memory_space<vmem>>, vector<16x128xbf16>
    %cst = arith.constant dense<0.000000e+00> : vector<72x128xf32>
    %2 = tpu.matmul %0, %1, %cst {dimension_numbers = #tpu.dot_dimension_numbers<[1], [0], [0], [1], [0, 0, 1, 1], [], []>} : vector<72x16xbf16>, vector<16x128xbf16>, vector<72x128xf32> -> vector<72x128xf32>
    %c0_3 = arith.constant 0 : index
    %c0_4 = arith.constant 0 : index
    %3 = vector.load %arg2[%c0_3, %c0_4] : memref<1x128xf32, #tpu.memory_space<vmem>>, vector<1x128xf32>
    %4 = vector.broadcast %3 : vector<1x128xf32> to vector<72x128xf32>
    %5 = arith.addf %2, %4 : vector<72x128xf32>
    %cst_5 = arith.constant 0.000000e+00 : f32
    %6 = vector.broadcast %cst_5 : f32 to vector<72x128xf32>
    %7 = arith.maximumf %5, %6 : vector<72x128xf32>
    %8 = vector.extract_strided_slice %7 {offsets = [0, 0], sizes = [8, 128], strides = [1, 1]} : vector<72x128xf32> to vector<8x128xf32>
    %9 = vector.extract_strided_slice %7 {offsets = [8, 0], sizes = [8, 128], strides = [1, 1]} : vector<72x128xf32> to vector<8x128xf32>
    %10 = vector.extract_strided_slice %7 {offsets = [16, 0], sizes = [8, 128], strides = [1, 1]} : vector<72x128xf32> to vector<8x128xf32>
    %11 = vector.extract_strided_slice %7 {offsets = [24, 0], sizes = [8, 128], strides = [1, 1]} : vector<72x128xf32> to vector<8x128xf32>
    %12 = vector.extract_strided_slice %7 {offsets = [32, 0], sizes = [8, 128], strides = [1, 1]} : vector<72x128xf32> to vector<8x128xf32>
    %13 = vector.extract_strided_slice %7 {offsets = [40, 0], sizes = [8, 128], strides = [1, 1]} : vector<72x128xf32> to vector<8x128xf32>
    %14 = vector.extract_strided_slice %7 {offsets = [48, 0], sizes = [8, 128], strides = [1, 1]} : vector<72x128xf32> to vector<8x128xf32>
    %15 = vector.extract_strided_slice %7 {offsets = [56, 0], sizes = [8, 128], strides = [1, 1]} : vector<72x128xf32> to vector<8x128xf32>
    %16 = vector.extract_strided_slice %7 {offsets = [64, 0], sizes = [8, 128], strides = [1, 1]} : vector<72x128xf32> to vector<8x128xf32>
    %17 = tpu.concatenate %8, %9, %10, %11, %12, %13, %14, %15, %16 in 1 : vector<8x128xf32>, vector<8x128xf32>, vector<8x128xf32>, vector<8x128xf32>, vector<8x128xf32>, vector<8x128xf32>, vector<8x128xf32>, vector<8x128xf32>, vector<8x128xf32> -> vector<8x1152xf32>
    %18 = arith.truncf %17 : vector<8x1152xf32> to vector<8x1152xbf16>
    %c0_6 = arith.constant 0 : index
    %c0_7 = arith.constant 0 : index
    %19 = vector.load %arg3[%c0_6, %c0_7] : memref<1152x768xbf16, #tpu.memory_space<vmem>>, vector<1152x768xbf16>
    %cst_8 = arith.constant dense<0.000000e+00> : vector<8x768xf32>
    %20 = tpu.matmul %18, %19, %cst_8 {dimension_numbers = #tpu.dot_dimension_numbers<[1], [0], [0], [1], [0, 0, 1, 1], [], []>} : vector<8x1152xbf16>, vector<1152x768xbf16>, vector<8x768xf32> -> vector<8x768xf32>
    %c0_9 = arith.constant 0 : index
    %c0_10 = arith.constant 0 : index
    %21 = vector.load %arg4[%c0_9, %c0_10] : memref<1x768xf32, #tpu.memory_space<vmem>>, vector<1x768xf32>
    %22 = vector.broadcast %21 : vector<1x768xf32> to vector<8x768xf32>
    %23 = arith.addf %20, %22 : vector<8x768xf32>
    %cst_11 = arith.constant 0.000000e+00 : f32
    %24 = vector.broadcast %cst_11 : f32 to vector<8x768xf32>
    %25 = arith.maximumf %23, %24 : vector<8x768xf32>
    %26 = arith.truncf %25 : vector<8x768xf32> to vector<8x768xbf16>
    tpu.wait_dma2 semaphore(%arg9 : memref<!tpu.dma_semaphore, #tpu.memory_space<semaphore_mem>>) src(%arg5 : memref<768x128xbf16, #tpu.memory_space<any>>) dst(%arg8 : memref<768x128xbf16, #tpu.memory_space<vmem>>)
    %c0_12 = arith.constant 0 : index
    %c0_13 = arith.constant 0 : index
    %27 = vector.load %arg8[%c0_12, %c0_13] : memref<768x128xbf16, #tpu.memory_space<vmem>>, vector<768x128xbf16>
    %cst_14 = arith.constant dense<0.000000e+00> : vector<8x128xf32>
    %28 = tpu.matmul %26, %27, %cst_14 {dimension_numbers = #tpu.dot_dimension_numbers<[1], [0], [0], [1], [0, 0, 1, 1], [], []>} : vector<8x768xbf16>, vector<768x128xbf16>, vector<8x128xf32> -> vector<8x128xf32>
    %c0_15 = arith.constant 0 : index
    %c0_16 = arith.constant 0 : index
    %29 = vector.load %arg6[%c0_15, %c0_16] : memref<1x128xf32, #tpu.memory_space<vmem>>, vector<1x128xf32>
    %30 = vector.broadcast %29 : vector<1x128xf32> to vector<8x128xf32>
    %31 = arith.addf %28, %30 : vector<8x128xf32>
    %c0_17 = arith.constant 0 : index
    %c0_18 = arith.constant 0 : index
    %32 = vector.load %arg7[%c0_17, %c0_18] : memref<8x128xf32, #tpu.memory_space<vmem>>, vector<8x128xf32>
    tpu.vector_store %arg7[%c0_17, %c0_18], %31 {strides = array<i32>} : memref<8x128xf32, #tpu.memory_space<vmem>>, vector<8x128xf32>,
    return
  }
}

</mosaic_0001>

<bundles_post_ra>
// kernel: inception_aux_forward.1
= control target key start
LH: loop header
LB: loop body
LE: loop exit
PB: predicated region body
PF: predicated region fallthrough
CT: control target
= control target key end

     0   :  { %12 = vsyncpa [#allocation5], 0  ;;  %s5672_s0 = inlined_call_operand.vmem [shape: bf16[72,16], index: 0, kind: input, shape index: {}]   ;;  %s5673_s1 = inlined_call_operand.hbm [shape: bf16[16,128], index: 1, kind: input, shape index: {}]   ;;  %s5674_s2 = inlined_call_operand.hbm [shape: f32[1,128], index: 2, kind: input, shape index: {}]   ;;  %s5675_s3 = inlined_call_operand.hbm [shape: bf16[1152,768], index: 3, kind: input, shape index: {}]   ;;  %s5676_s4 = inlined_call_operand.hbm [shape: f32[1,768], index: 4, kind: input, shape index: {}]   ;;  %s5677_s5 = inlined_call_operand.hbm [shape: bf16[768,128], index: 5, kind: input, shape index: {}]   ;;  %s5678_s6 = inlined_call_operand.hbm [shape: f32[1,128], index: 6, kind: input, shape index: {}]   ;;  %s5679_s7 = inlined_call_operand.vmem [shape: f32[8,128], index: 7, kind: output, shape index: {}]  }
   0x1   :  { %13 = vsyncpa [#allocation7], 0 }
   0x2   :  { %14 = vsyncpa [#allocation10], 0  ;;  %s5462_s24 = smov [#allocation6]   ;;  %s5463_s26 = smov [#allocation9]  }
   0x3   :  { %s35_s25 = sshll.u32 %s5462_s24, 4  ;;  %s57_s27 = sshll.u32 %s5463_s26, 4  ;;  %s36_s25 = int_to_ptr.vmem [resolvable:$true] %s35_s25  ;;  %s58_s27 = int_to_ptr.vmem [resolvable:$true] %s57_s27 }
   0x4   :  { %s5342_s28 = scalar_lea.vmem %s36_s25, 16  ;;  %s5346_s29 = scalar_lea.vmem %s36_s25, 32 }
   0x5   :  { %p5343_p0 = scmp.ne.s32.totalorder %s36_s25, %s5342_s28  ;;  %p5347_p1 = scmp.lt.s32.totalorder %s36_s25, %s36_s25 }
   0x6   :  { %p5348_p2 = scmp.lt.s32.totalorder %s5346_s29, %s5342_s28 }
   0x8   :  { %p5349_p3 = por %p5348_p2, %p5347_p1 }
   0xa   :  { %p5350_p4 = pnand %p5349_p3, %p5343_p0 }
   0xc   :  { %5353 = shalt.err (!%p5350_p4)
}
   0xd   :  { %38 = dma.hbm_to_vmem [thread:$0]  %s5674_s2, 16, %s36_s25, [#allocation7]  }
   0xe   :  { %s5362_s9 = scalar_lea.vmem %s58_s27, 96  ;;  %p5367_p6 = scmp.lt.s32.totalorder %s58_s27, %s58_s27 }
   0xf   :  { %p5363_p5 = scmp.ne.s32.totalorder %s58_s27, %s5362_s9  ;;  %p5368_p7 = scmp.lt.s32.totalorder %s5362_s9, %s5362_s9 }
  0x11   :  { %p5369_p8 = por %p5368_p7, %p5367_p6 }
  0x13   :  { %p5370_p9 = pnand %p5369_p8, %p5363_p5 }
  0x15   :  { %5373 = shalt.err (!%p5370_p9)
}
  0x16   :  { %60 = dma.hbm_to_vmem [thread:$0]  %s5676_s4, 96, %s58_s27, [#allocation10]  }
  0x17   :  { %s5464_s12 = smov [#allocation4]  }
  0x18   :  { %s22_s13 = sshll.u32 %s5464_s12, 4  ;;  %s23_s13 = int_to_ptr.vmem [resolvable:$true] %s22_s13 }
  0x19   :  { %s5382_s14 = scalar_lea.vmem %s23_s13, 128  ;;  %p5387_p11 = scmp.lt.s32.totalorder %s23_s13, %s23_s13 }
  0x1a   :  { %p5383_p10 = scmp.ne.s32.totalorder %s23_s13, %s5382_s14  ;;  %p5388_p12 = scmp.lt.s32.totalorder %s5382_s14, %s5382_s14 }
  0x1c   :  { %p5389_p13 = por %p5388_p12, %p5387_p11 }
  0x1e   :  { %p5390_p0 = pnand %p5389_p13, %p5383_p10 }
  0x20   :  { %5393 = shalt.err (!%p5390_p0)
}
  0x21   :  { %s5465_s2 = smov 64   ;;  %s5466_s15 = smov 4  }
  0x22   :  { %28 = dma.hbm_to_vmem [thread:$0]  %s5673_s1, 128, %s23_s13, [#allocation5], %s5465_s2, %s5465_s2, %s5466_s15  }
  0x23   :  { %s5467_s18 = smov [#allocation8]  }
  0x24   :  { %s44_s19 = sshll.u32 %s5467_s18, 4  ;;  %s45_s19 = int_to_ptr.vmem [resolvable:$true] %s44_s19 }
  0x25   :  { %s5402_s4 = scalar_lea.vmem %s45_s19, 55296  ;;  %p5407_p2 = scmp.lt.s32.totalorder %s45_s19, %s45_s19 }
  0x26   :  { %p5403_p1 = scmp.ne.s32.totalorder %s45_s19, %s5402_s4  ;;  %p5408_p3 = scmp.lt.s32.totalorder %s5402_s4, %s5402_s4 }
  0x28   :  { %p5409_p4 = por %p5408_p3, %p5407_p2 }
  0x2a   :  { %p5410_p5 = pnand %p5409_p4, %p5403_p1 }
  0x2c   :  { %5413 = shalt.err (!%p5410_p5)
}
  0x2d   :  { %s5468_s20 = smov 384   ;;  %s5469_s21 = smov 24  }
  0x2e   :  { %50 = dma.hbm_to_vmem [thread:$0]  %s5675_s3, 55296, %s45_s19, [#allocation7], %s5468_s20, %s5468_s20, %s5469_s21  }
  0x2f   :  { %s5470_s24 = smov [#allocation11]  }
  0x30   :  { %s67_s25 = sshll.u32 %s5470_s24, 4  ;;  %s68_s25 = int_to_ptr.vmem [resolvable:$true] %s67_s25 }
  0x31   :  { %s5422_s1 = scalar_lea.vmem %s68_s25, 16  ;;  %s5426_s26 = scalar_lea.vmem %s68_s25, 32 }
  0x32   :  { %p5423_p6 = scmp.ne.s32.totalorder %s68_s25, %s5422_s1  ;;  %p5427_p7 = scmp.lt.s32.totalorder %s68_s25, %s68_s25 }
  0x33   :  { %p5428_p8 = scmp.lt.s32.totalorder %s5426_s26, %s5422_s1 }
  0x35   :  { %p5429_p9 = por %p5428_p8, %p5427_p7 }
  0x37   :  { %p5430_p10 = pnand %p5429_p9, %p5423_p6 }
  0x39   :  { %5433 = shalt.err (!%p5430_p10)
}
  0x3a   :  { %70 = dma.hbm_to_vmem [thread:$0]  %s5678_s6, 16, %s68_s25, [#allocation10]  }
  0x3b   :  { %5454 = dma.done.wait [#allocation5], 128  }
  0x3c   :  { %5455 = vsyncadd [#allocation5], 4294967168 }
  0x3d   :  { %5456 = dma.done.wait [#allocation7], 55312  }
  0x3e   :  { %5457 = vsyncadd [#allocation7], 4294911984 }
  0x3f   :  { %5458 = dma.done.wait [#allocation10], 112  }
  0x40   :  { %5459 = vsyncadd [#allocation10], 4294967184  ;;  %v5471_v0 = vmov 0.0   ;;  %vm5472_vm0 = vmmov 0   ;;  %v4632_v1 = vld [vmem:[#allocation4] sm:$0xff]   ;;  %vm145_vm1 = vcmask 130048  }
  0x41   :  { %4597 = vmatprep.subr.bf16.mxu0 %v5471_v0  ;;  %4599 = vmatprep.mubr.msk.bf16.mxu0 %vm5472_vm0, %v5471_v0  ;;  %v4633_v2 = vld [vmem:[%s5672_s0] sm:$0xff]   ;;  %v4640_v4 = vld [vmem:[#allocation8 + $0x150] ss:$24 sps:$4 sm:$0xff]   ;;  %v4634_v6 = vld [vmem:[%s5672_s0 + $0x8] sm:$0xff]  }
  0x42   :  { %4598 = vmatpush3.bf16.msra.mxu0 %v4632_v1  ;;  %v4638_v3 = vld [vmem:[#allocation8 + $0x154] ss:$24 sps:$4 sm:$0xff]   ;;  %v4641_v5 = vld [vmem:[#allocation8 + $0x124] ss:$24 sps:$4 sm:$0xff]   ;;  %v4643_v7 = vld [vmem:[#allocation8 + $0x120] ss:$24 sps:$4 sm:$0xff]  }
  0x43   :  { %2875 = vmatprep.subr.bf16.mxu1 %v4638_v3  ;;  %v4644_v8 = vld [vmem:[#allocation8 + $0xf4] ss:$24 sps:$4 sm:$0xff]   ;;  %v4646_v10 = vld [vmem:[#allocation8 + $0x450] ss:$24 sps:$4 sm:$0xff]   ;;  %v4654_v12 = vld [vmem:[#allocation8 + $0x424] ss:$24 sps:$4 sm:$0xff]  }
  0x44   :  { %2876 = vmatpush1.bf16.msra.mxu1 %v4640_v4  ;;  %v4648_v9 = vld [vmem:[#allocation8 + $0x454] ss:$24 sps:$4 sm:$0xff]   ;;  %v4649_v11 = vld [vmem:[#allocation8 + $0xf0] ss:$24 sps:$4 sm:$0xff]   ;;  %v4650_v13 = vld [vmem:[#allocation8 + $0xc4] ss:$24 sps:$4 sm:$0xff]  }
  0x45   :  { %4600 = vmatmul.mubr.msk.bf16.vlgmr.msra.gmra.mxu0 %vm145_vm1, %v4633_v2  ;;  %2877 = vmatprep.subr.bf16.mxu1 %v4641_v5  ;;  %v4635_v14 = vld [vmem:[%s5672_s0 + $0x10] sm:$0xff]   ;;  %v4652_v15 = vld [vmem:[#allocation8 + $0x420] ss:$24 sps:$4 sm:$0xff]   ;;  %v4636_v23 = vld [vmem:[%s5672_s0 + $0x18] sm:$0xff]  }
  0x46   :  { %4603 = vmatprep.mubr.msk.bf16.mxu0 %vm5472_vm0, %v5471_v0  ;;  %2916 = vmatprep.subr.bf16.mxu0 %v4648_v9  ;;  %v4660_v16 = vld [vmem:[#allocation8 + $0x3f4] ss:$24 sps:$4 sm:$0xff]   ;;  %v4655_v17 = vld [vmem:[#allocation8 + $0xc0] ss:$24 sps:$4 sm:$0xff]   ;;  %v4658_v19 = vld [vmem:[#allocation8 + $0x3f0] ss:$24 sps:$4 sm:$0xff]  }
  0x47   :  { %2917 = vmatpush1.bf16.msra.mxu0 %v4646_v10  ;;  %v4656_v18 = vld [vmem:[#allocation8 + $0x94] ss:$24 sps:$4 sm:$0xff]   ;;  %v4666_v20 = vld [vmem:[#allocation8 + $0x3c4] ss:$24 sps:$4 sm:$0xff]   ;;  %v4661_v21 = vld [vmem:[#allocation8 + $0x90] ss:$24 sps:$4 sm:$0xff]  }
  0x48   :  { %2878 = vmatpush1.bf16.msra.mxu1 %v4643_v7  ;;  %2918 = vmatprep.subr.bf16.mxu0 %v4654_v12  ;;  %v4662_v22 = vld [vmem:[#allocation8 + $0x64] ss:$24 sps:$4 sm:$0xff]   ;;  %v4664_v24 = vld [vmem:[#allocation8 + $0x3c0] ss:$24 sps:$4 sm:$0xff]   ;;  %v4672_v25 = vld [vmem:[#allocation8 + $0x394] ss:$24 sps:$4 sm:$0xff]  }
  0x49   :  { %2879 = vmatprep.subr.bf16.mxu1 %v4644_v8  ;;  %v4667_v26 = vld [vmem:[#allocation8 + $0x60] ss:$24 sps:$4 sm:$0xff]   ;;  %v4668_v27 = vld [vmem:[#allocation8 + $0x34] ss:$24 sps:$4 sm:$0xff]   ;;  %v4670_v28 = vld [vmem:[#allocation8 + $0x390] ss:$24 sps:$4 sm:$0xff]  }
  0x4a   :  { %v4678_v29 = vld [vmem:[#allocation8 + $0x364] ss:$24 sps:$4 sm:$0xff]   ;;  %v4673_v30 = vld [vmem:[#allocation8 + $0x30] ss:$24 sps:$4 sm:$0xff]   ;;  %v4637_v32 = vld [vmem:[%s5672_s0 + $0x20] ss:$0 sps:$4 sm:$0xff]  }
  0x4b   :  { %2919 = vmatpush1.bf16.msra.mxu0 %v4652_v15  ;;  %v4674_v31 = vld [vmem:[#allocation8 + $0x4] ss:$24 sps:$4 sm:$0xff]   ;;  %v4676_v33 = vld [vmem:[#allocation8 + $0x360] ss:$24 sps:$4 sm:$0xff]   ;;  %v4684_v34 = vld [vmem:[#allocation8 + $0x334] ss:$24 sps:$4 sm:$0xff]  }
  0x4c   :  { %2880 = vmatpush1.bf16.msra.mxu1 %v4649_v11  ;;  %2920 = vmatprep.subr.bf16.mxu0 %v4660_v16  ;;  %v4679_v35 = vld [vmem:[#allocation8] ss:$24 sps:$4 sm:$0xff]   ;;  %v4680_v36 = vld [vmem:[#allocation8 + $0x2d4] ss:$24 sps:$4 sm:$0xff]   ;;  %v4682_v37 = vld [vmem:[#allocation8 + $0x330] ss:$24 sps:$4 sm:$0xff]  }
  0x4d   :  { %4604 = vmatmul.mubr.msk.bf16.gmra.mxu0 %vm145_vm1, %v4634_v6  ;;  %2881 = vmatprep.subr.bf16.mxu1 %v4650_v13  ;;  %v4690_v38 = vld [vmem:[#allocation8 + $0x304] ss:$24 sps:$4 sm:$0xff]   ;;  %v4685_v39 = vld [vmem:[#allocation8 + $0x2d0] ss:$24 sps:$4 sm:$0xff]   ;;  %v4688_v41 = vld [vmem:[#allocation8 + $0x300] ss:$24 sps:$4 sm:$0xff]  }
  0x4e   :  { %4607 = vmatprep.mubr.msk.bf16.mxu0 %vm5472_vm0, %v5471_v0  ;;  %v4686_v40 = vld [vmem:[#allocation8 + $0x2a4] ss:$24 sps:$4 sm:$0xff]   ;;  %v4691_v42 = vld [vmem:[#allocation8 + $0x2a0] ss:$24 sps:$4 sm:$0xff]   ;;  %v4692_v43 = vld [vmem:[#allocation8 + $0x274] ss:$24 sps:$4 sm:$0xff]  }
  0x4f   :  { %2921 = vmatpush1.bf16.msra.mxu0 %v4658_v19  ;;  %v4696_v44 = vld [vmem:[#allocation8 + $0x5d4] ss:$24 sps:$4 sm:$0xff]   ;;  %v4694_v45 = vld [vmem:[#allocation8 + $0x5d0] ss:$24 sps:$4 sm:$0xff]   ;;  %v4702_v46 = vld [vmem:[#allocation8 + $0x5a4] ss:$24 sps:$4 sm:$0xff]  }
  0x50   :  { %2882 = vmatpush1.bf16.msra.mxu1 %v4655_v17  ;;  %2922 = vmatprep.subr.bf16.mxu0 %v4666_v20  ;;  %v4697_v47 = vld [vmem:[#allocation8 + $0x270] ss:$24 sps:$4 sm:$0xff]   ;;  %v4698_v48 = vld [vmem:[#allocation8 + $0x244] ss:$24 sps:$4 sm:$0xff]   ;;  %v4700_v49 = vld [vmem:[#allocation8 + $0x5a0] ss:$24 sps:$4 sm:$0xff]  }
  0x51   :  { %2883 = vmatprep.subr.bf16.mxu1 %v4656_v18  ;;  %v4708_v50 = vld [vmem:[#allocation8 + $0x574] ss:$24 sps:$4 sm:$0xff]   ;;  %v4703_v51 = vld [vmem:[#allocation8 + $0x240] ss:$24 sps:$4 sm:$0xff]   ;;  %v4706_v53 = vld [vmem:[#allocation8 + $0x570] ss:$24 sps:$4 sm:$0xff]  }
  0x52   :  { %v4704_v52 = vld [vmem:[#allocation8 + $0x214] ss:$24 sps:$4 sm:$0xff]   ;;  %v4714_v54 = vld [vmem:[#allocation8 + $0x544] ss:$24 sps:$4 sm:$0xff]   ;;  %v4709_v55 = vld [vmem:[#allocation8 + $0x210] ss:$24 sps:$4 sm:$0xff]  }
  0x53   :  { %2923 = vmatpush1.bf16.msra.mxu0 %v4664_v24  ;;  %v4710_v56 = vld [vmem:[#allocation8 + $0x1e4] ss:$24 sps:$4 sm:$0xff]   ;;  %v4712_v57 = vld [vmem:[#allocation8 + $0x540] ss:$24 sps:$4 sm:$0xff]   ;;  %v4716_v59 = vld [vmem:[#allocation8 + $0x1b4] ss:$24 sps:$4 sm:$0xff]  }
  0x54   :  { %2884 = vmatpush1.bf16.msra.mxu1 %v4661_v21  ;;  %2924 = vmatprep.subr.bf16.mxu0 %v4672_v25  ;;  %v4715_v58 = vld [vmem:[#allocation8 + $0x1e0] ss:$24 sps:$4 sm:$0xff]   ;;  %v4720_v60 = vld [vmem:[#allocation8 + $0x514] ss:$24 sps:$4 sm:$0xff]   ;;  %v4718_v61 = vld [vmem:[#allocation8 + $0x510] ss:$24 sps:$4 sm:$0xff]  }
  0x55   :  { %4608 = vmatmul.mubr.msk.bf16.gmra.mxu0 %vm145_vm1, %v4635_v14  ;;  %2885 = vmatprep.subr.bf16.mxu1 %v4662_v22  ;;  %v4721_v62 = vld [vmem:[#allocation8 + $0x1b0] ss:$24 sps:$4 sm:$0xff]   ;;  %v4722_v63 = vld [vmem:[#allocation8 + $0x184] ss:$24 sps:$4 sm:$0xff]   ;;  %v4724_v1 = vld [vmem:[#allocation8 + $0x4e0] ss:$24 sps:$4 sm:$0xff]  }
  0x56   :  { %4611 = vmatprep.mubr.msk.bf16.mxu0 %vm5472_vm0, %v5471_v0  ;;  %v4727_v2 = vld [vmem:[#allocation8 + $0x180] ss:$24 sps:$4 sm:$0xff]   ;;  %v4730_v3 = vld [vmem:[#allocation8 + $0x4b4] ss:$24 sps:$4 sm:$0xff]   ;;  %v4728_v5 = vld [vmem:[#allocation8 + $0x4b0] ss:$24 sps:$4 sm:$0xff]  }
  0x57   :  { %2925 = vmatpush1.bf16.msra.mxu0 %v4670_v28  ;;  %v4733_v4 = vld [vmem:[#allocation8 + $0x754] ss:$24 sps:$4 sm:$0xff]   ;;  %v4736_v6 = vld [vmem:[#allocation8 + $0x484] ss:$24 sps:$4 sm:$0xff]   ;;  %v4734_v7 = vld [vmem:[#allocation8 + $0x480] ss:$24 sps:$4 sm:$0xff]  }
  0x58   :  { %2886 = vmatpush1.bf16.msra.mxu1 %v4667_v26  ;;  %2926 = vmatprep.subr.bf16.mxu0 %v4678_v29  ;;  %v4745_v8 = vld [vmem:[#allocation8 + $0xa54] ss:$24 sps:$4 sm:$0xff]   ;;  %v5561_v9 = vld [vmem:[#allocation6] ss:$0 sm:$0xff]  ;;  %v4731_v21 = vld [vmem:[#allocation8 + $0x750] ss:$24 sps:$4 sm:$0xff]  }
  0x59   :  { %2887 = vmatprep.subr.bf16.mxu1 %v4668_v27  ;;  %v4739_v24 = vld [vmem:[#allocation8 + $0x724] ss:$24 sps:$4 sm:$0xff]   ;;  %v4737_v28 = vld [vmem:[#allocation8 + $0x720] ss:$24 sps:$4 sm:$0xff]   ;;  %v4742_v29 = vld [vmem:[#allocation8 + $0x6f4] ss:$24 sps:$4 sm:$0xff]  }
  0x5a   :  { %s5474_s0 = smov [#allocation2]  }
  0x5b   :  { %2927 = vmatpush1.bf16.msra.mxu0 %v4676_v33  ;;  %v4743_v33 = vld [vmem:[#allocation8 + $0xa50] ss:$24 sps:$4 sm:$0xff]   ;;  %s94_s14 = sshll.u32 %s5474_s0, 4  ;;  %s95_s14 = int_to_ptr.vmem [resolvable:$true] %s94_s14 }
  0x5c   :  { %2888 = vmatpush1.bf16.msra.mxu1 %v4673_v30  ;;  %2928 = vmatprep.subr.bf16.mxu0 %v4684_v34  ;;  %s5442_s2 = scalar_lea.vmem %s95_s14, 6144  ;;  %p5447_p12 = scmp.lt.s32.totalorder %s95_s14, %s95_s14 }
  0x5d   :  { %4612 = vmatmul.mubr.msk.bf16.gmra.mxu0 %vm145_vm1, %v4636_v23  ;;  %2889 = vmatprep.subr.bf16.mxu1 %v4674_v31  ;;  %p5443_p11 = scmp.ne.s32.totalorder %s95_s14, %s5442_s2  ;;  %p5448_p13 = scmp.lt.s32.totalorder %s5442_s2, %s5442_s2 }
  0x5e   :  { %4615 = vmatprep.mubr.msk.bf16.mxu0 %vm5472_vm0, %v5471_v0  ;;  %v4726_v0 = vld [vmem:[#allocation8 + $0x4e4] ss:$24 sps:$4 sm:$0xff]  }
  0x5f   :  { %2929 = vmatpush1.bf16.msra.mxu0 %v4682_v37  ;;  %v4748_v37 = vld [vmem:[#allocation8 + $0x6c4] ss:$24 sps:$4 sm:$0xff]   ;;  %p5449_p0 = por %p5448_p13, %p5447_p12 }
  0x60   :  { %2890 = vmatpush1.bf16.msra.mxu1 %v4679_v35  ;;  %2930 = vmatprep.subr.bf16.mxu0 %v4690_v38  ;;  %v4751_v38 = vld [vmem:[#allocation8 + $0xa24] ss:$24 sps:$4 sm:$0xff]  }
  0x61   :  { %2891 = vmatprep.subr.bf16.mxu1 %v4680_v36  ;;  %p5450_p1 = pnand %p5449_p0, %p5443_p11 }
  0x63   :  { %2931 = vmatpush1.bf16.msra.mxu0 %v4688_v41  ;;  %v4746_v41 = vld [vmem:[#allocation8 + $0x6c0] ss:$24 sps:$4 sm:$0xff]  }
  0x64   :  { %2892 = vmatpush2.bf16.msra.mxu1 %v4685_v39  ;;  %2932 = vmatprep.subr.bf16.mxu0 %v4696_v44  ;;  %v4754_v44 = vld [vmem:[#allocation8 + $0x694] ss:$24 sps:$4 sm:$0xff]  }
  0x65   :  { %4616 = vmatmul.mubr.msk.bf16.gmra.mxu0 %vm145_vm1, %v4637_v32  ;;  %2893 = vmatprep.subr.bf16.mxu1 %v4686_v40  ;;  %v4740_v32 = vld [vmem:[#allocation8 + $0x6f0] ss:$24 sps:$4 sm:$0xff]  }
  0x67   :  { %2933 = vmatpush2.bf16.msra.mxu0 %v4694_v45  ;;  %v4757_v45 = vld [vmem:[#allocation8 + $0x9f4] ss:$24 sps:$4 sm:$0xff]  }
  0x68   :  { %2894 = vmatpush2.bf16.msra.mxu1 %v4691_v42  ;;  %2934 = vmatprep.subr.bf16.mxu0 %v4702_v46  ;;  %v4749_v42 = vld [vmem:[#allocation8 + $0xa20] ss:$24 sps:$4 sm:$0xff]  }
  0x69   :  { %2895 = vmatprep.subr.bf16.mxu1 %v4692_v43 }
  0x6b   :  { %2935 = vmatpush2.bf16.msra.mxu0 %v4700_v49  ;;  %v4752_v49 = vld [vmem:[#allocation8 + $0x690] ss:$24 sps:$4 sm:$0xff]  }
  0x6c   :  { %2896 = vmatpush2.bf16.msra.mxu1 %v4697_v47  ;;  %2936 = vmatprep.subr.bf16.mxu0 %v4708_v50  ;;  %v4755_v50 = vld [vmem:[#allocation8 + $0x9f0] ss:$24 sps:$4 sm:$0xff]  }
  0x6d   :  { %2897 = vmatprep.subr.bf16.mxu1 %v4698_v48 }
  0x6f   :  { %2937 = vmatpush2.bf16.msra.mxu0 %v4706_v53  ;;  %v4763_v53 = vld [vmem:[#allocation8 + $0x9c4] ss:$24 sps:$4 sm:$0xff]  }
  0x70   :  { %2898 = vmatpush2.bf16.msra.mxu1 %v4703_v51  ;;  %2938 = vmatprep.subr.bf16.mxu0 %v4714_v54 }
  0x71   :  { %2899 = vmatprep.subr.bf16.mxu1 %v4704_v52  ;;  %v4760_v52 = vld [vmem:[#allocation8 + $0x664] ss:$24 sps:$4 sm:$0xff]  }
  0x73   :  { %2939 = vmatpush2.bf16.msra.mxu0 %v4712_v57  ;;  %v4761_v57 = vld [vmem:[#allocation8 + $0x9c0] ss:$24 sps:$4 sm:$0xff]  }
  0x74   :  { %2900 = vmatpush2.bf16.msra.mxu1 %v4709_v55  ;;  %2940 = vmatprep.subr.bf16.mxu0 %v4720_v60  ;;  %v4769_v60 = vld [vmem:[#allocation8 + $0x994] ss:$24 sps:$4 sm:$0xff]  }
  0x75   :  { %2901 = vmatprep.subr.bf16.mxu1 %v4710_v56  ;;  %v4758_v56 = vld [vmem:[#allocation8 + $0x660] ss:$24 sps:$4 sm:$0xff]  }
  0x77   :  { %2941 = vmatpush2.bf16.msra.mxu0 %v4718_v61 }
  0x78   :  { %2902 = vmatpush2.bf16.msra.mxu1 %v4715_v58  ;;  %2942 = vmatprep.subr.bf16.mxu0 %v4726_v0  ;;  %v4764_v0 = vld [vmem:[#allocation8 + $0x630] ss:$24 sps:$4 sm:$0xff]  }
  0x79   :  { %2903 = vmatprep.subr.bf16.mxu1 %v4716_v59  ;;  %v4766_v59 = vld [vmem:[#allocation8 + $0x634] ss:$24 sps:$4 sm:$0xff]  }
  0x7b   :  { %2943 = vmatpush2.bf16.msra.mxu0 %v4724_v1  ;;  %v4767_v1 = vld [vmem:[#allocation8 + $0x990] ss:$24 sps:$4 sm:$0xff]  }
  0x7c   :  { %2904 = vmatpush2.bf16.msra.mxu1 %v4721_v62  ;;  %2944 = vmatprep.subr.bf16.mxu0 %v4730_v3 }
  0x7d   :  { %2905 = vmatprep.subr.bf16.mxu1 %v4722_v63 }
  0x7f   :  { %2945 = vmatpush2.bf16.msra.mxu0 %v4728_v5  ;;  %v4775_v5 = vld [vmem:[#allocation8 + $0x964] ss:$24 sps:$4 sm:$0xff]  }
  0x80   :  { %2906 = vmatpush2.bf16.msra.mxu1 %v4727_v2  ;;  %2946 = vmatprep.subr.bf16.mxu0 %v4736_v6 }
  0x81   :  { %2957 = vmatprep.subr.bf16.mxu1 %v4733_v4  ;;  %v4772_v4 = vld [vmem:[#allocation8 + $0x604] ss:$24 sps:$4 sm:$0xff]  }
  0x83   :  { %2947 = vmatpush2.bf16.msra.mxu0 %v4734_v7 }
  0x84   :  { %2998 = vmatprep.subr.bf16.mxu0 %v4745_v8  ;;  %v4770_v8 = vld [vmem:[#allocation8 + $0x600] ss:$24 sps:$4 sm:$0xff]  }
 0x105   :  { %v195_v10 = vpop.f32.mrf.mxu0 }
 0x106   :  { %v196_v11 = vadd.f32 %v5561_v9, %v195_v10  ;;  %v4773_v10 = vld [vmem:[#allocation8 + $0x960] ss:$24 sps:$4 sm:$0xff]  }
 0x107   :  { %v4601_v12 = vpop.f32.mrf.mxu0 }
 0x108   :  { %v233_v15 = vmax.f32 %v196_v11, 0.0  ;;  %v4778_v11 = vld [vmem:[#allocation8 + $0x8d4] ss:$24 sps:$4 sm:$0xff]  }
 0x109   :  { %v198_v13 = vpop.f32.mrf.mxu0  ;;  %v4781_v12 = vld [vmem:[#allocation8 + $0x934] ss:$24 sps:$4 sm:$0xff]  }
 0x10a   :  { %v199_v14 = vadd.f32 %v5561_v9, %v198_v13  ;;  %v5568_v22 = vpack.c.bf16 %v233_v15, %v233_v15  ;;  %v4779_v15 = vld [vmem:[#allocation8 + $0x930] ss:$24 sps:$4 sm:$0xff]  }
 0x10b   :  { %v4602_v16 = vpop.f32.mrf.mxu0 }
 0x10c   :  { %v234_v17 = vmax.f32 %v199_v14, 0.0  ;;  %v4776_v14 = vld [vmem:[#allocation8 + $0x8d0] ss:$24 sps:$4 sm:$0xff]   ;;  %v4784_v16 = vld [vmem:[#allocation8 + $0x8a4] ss:$24 sps:$4 sm:$0xff]  }
 0x10d   :  { %v203_v18 = vpop.f32.mrf.mxu0 }
 0x10e   :  { %v5565_v19 = vpack.c.bf16 %v234_v17, %v234_v17  ;;  %v204_v20 = vadd.f32 %v5561_v9, %v203_v18  ;;  %v4787_v17 = vld [vmem:[#allocation8 + $0x904] ss:$24 sps:$4 sm:$0xff]   ;;  %v4782_v18 = vld [vmem:[#allocation8 + $0x8a0] ss:$24 sps:$4 sm:$0xff]  }
 0x10f   :  { %v4605_v23 = vpop.f32.mrf.mxu0 }
 0x110   :  { %2907 = vmatprep.mubr.bf16.mxu1 %v5565_v19  ;;  %v235_v25 = vmax.f32 %v204_v20, 0.0  ;;  %v4785_v20 = vld [vmem:[#allocation8 + $0x900] ss:$24 sps:$4 sm:$0xff]   ;;  %v4793_v23 = vld [vmem:[#allocation8 + $0xbd4] ss:$24 sps:$4 sm:$0xff]  }
 0x111   :  { %v206_v26 = vpop.f32.mrf.mxu0  ;;  %2908 = vmatmul.mubr.bf16.vlgmr.msra.gmra.mxu1 %v5568_v22 }
 0x112   :  { %v207_v27 = vadd.f32 %v5561_v9, %v206_v26  ;;  %2958 = vmatpush1.bf16.msra.mxu1 %v4731_v21  ;;  %v5573_v34 = vpack.c.bf16 %v235_v25, %v235_v25  ;;  %v4790_v21 = vld [vmem:[#allocation8 + $0x874] ss:$24 sps:$4 sm:$0xff]   ;;  %v4791_v25 = vld [vmem:[#allocation8 + $0xbd0] ss:$24 sps:$4 sm:$0xff]   ;;  %v4796_v26 = vld [vmem:[#allocation8 + $0x844] ss:$24 sps:$4 sm:$0xff]  }
 0x113   :  { %2959 = vmatprep.subr.bf16.mxu1 %v4739_v24  ;;  %v4606_v30 = vpop.f32.mrf.mxu0  ;;  %v4788_v24 = vld [vmem:[#allocation8 + $0x870] ss:$24 sps:$4 sm:$0xff]  }
 0x114   :  { %v236_v31 = vmax.f32 %v207_v27, 0.0  ;;  %v4799_v27 = vld [vmem:[#allocation8 + $0xba4] ss:$24 sps:$4 sm:$0xff]   ;;  %v4802_v30 = vld [vmem:[#allocation8 + $0x814] ss:$24 sps:$4 sm:$0xff]  }
 0x115   :  { %v5575_v35 = vpop.f32.mrf.mxu0 }
 0x116   :  { %v5577_v36 = vpack.c.bf16 %v236_v31, %v236_v31  ;;  %2960 = vmatpush1.bf16.msra.mxu1 %v4737_v28  ;;  %v4794_v28 = vld [vmem:[#allocation8 + $0x840] ss:$24 sps:$4 sm:$0xff]   ;;  %v4805_v31 = vld [vmem:[#allocation8 + $0xb74] ss:$24 sps:$4 sm:$0xff]  }
 0x117   :  { %2961 = vmatprep.subr.bf16.mxu1 %v4742_v29  ;;  %v4609_v39 = vpop.f32.mrf.mxu0  ;;  %v4797_v29 = vld [vmem:[#allocation8 + $0xba0] ss:$24 sps:$4 sm:$0xff]  }
 0x118   :  { %2948 = vmatprep.mubr.bf16.mxu0 %v5577_v36  ;;  %v4806_v39 = vld [vmem:[#allocation8 + $0x7e0] ss:$24 sps:$4 sm:$0xff]  }
 0x119   :  { %2949 = vmatmul.mubr.bf16.vlgmr.msra.gmra.mxu0 %v5573_v34  ;;  %v214_v40 = vpop.f32.mrf.mxu0 }
 0x11a   :  { %2962 = vmatpush1.bf16.msra.mxu1 %v4740_v32  ;;  %2999 = vmatpush1.bf16.msra.mxu0 %v4743_v33  ;;  %v215_v43 = vadd.f32 %v5561_v9, %v214_v40  ;;  %v4800_v32 = vld [vmem:[#allocation8 + $0x810] ss:$24 sps:$4 sm:$0xff]   ;;  %v4809_v40 = vld [vmem:[#allocation8 + $0xb40] ss:$24 sps:$4 sm:$0xff]  }
 0x11b   :  { %2963 = vmatprep.subr.bf16.mxu1 %v4748_v37  ;;  %3000 = vmatprep.subr.bf16.mxu0 %v4751_v38  ;;  %v4610_v46 = vpop.f32.mrf.mxu0  ;;  %v4803_v33 = vld [vmem:[#allocation8 + $0xb70] ss:$24 sps:$4 sm:$0xff]   ;;  %v4808_v37 = vld [vmem:[#allocation8 + $0x7e4] ss:$24 sps:$4 sm:$0xff]  }
 0x11c   :  { %v238_v47 = vmax.f32 %v215_v43, 0.0  ;;  %v4811_v38 = vld [vmem:[#allocation8 + $0xb44] ss:$24 sps:$4 sm:$0xff]   ;;  %v4812_v43 = vld [vmem:[#allocation8 + $0x7b0] ss:$24 sps:$4 sm:$0xff]  }
 0x11d   :  { %v5582_v48 = vpop.f32.mrf.mxu0  ;;  %v4820_v46 = vld [vmem:[#allocation8 + $0x784] ss:$24 sps:$4 sm:$0xff]  }
 0x11e   :  { %2964 = vmatpush1.bf16.msra.mxu1 %v4746_v41  ;;  %3001 = vmatpush1.bf16.msra.mxu0 %v4749_v42  ;;  %v5584_v51 = vpack.c.bf16 %v238_v47, %v238_v47  ;;  %v4814_v41 = vld [vmem:[#allocation8 + $0x7b4] ss:$24 sps:$4 sm:$0xff]   ;;  %v4823_v47 = vld [vmem:[#allocation8 + $0xae4] ss:$24 sps:$4 sm:$0xff]  }
 0x11f   :  { %2965 = vmatprep.subr.bf16.mxu1 %v4754_v44  ;;  %3002 = vmatprep.subr.bf16.mxu0 %v4757_v45  ;;  %v4613_v54 = vpop.f32.mrf.mxu0  ;;  %v4817_v42 = vld [vmem:[#allocation8 + $0xb14] ss:$24 sps:$4 sm:$0xff]   ;;  %v4815_v44 = vld [vmem:[#allocation8 + $0xb10] ss:$24 sps:$4 sm:$0xff]   ;;  %v212_v45 = vadd.f32 %v5561_v9, %v5575_v35 }
 0x120   :  { %2989 = vmatprep.mubr.bf16.mxu1 %v5584_v51  ;;  %v4829_v54 = vld [vmem:[#allocation8 + $0xd54] ss:$24 sps:$4 sm:$0xff]   ;;  %v4827_v35 = vld [vmem:[#allocation8 + $0xd50] ss:$24 sps:$4 sm:$0xff]  }
 0x121   :  { %v222_v55 = vpop.f32.mrf.mxu0 }
 0x122   :  { %2966 = vmatpush1.bf16.msra.mxu1 %v4752_v49  ;;  %3003 = vmatpush1.bf16.msra.mxu0 %v4755_v50  ;;  %v223_v58 = vadd.f32 %v5561_v9, %v222_v55  ;;  %v4818_v49 = vld [vmem:[#allocation8 + $0x780] ss:$24 sps:$4 sm:$0xff]   ;;  %v220_v55 = vadd.f32 %v5561_v9, %v5582_v48  ;;  %v4841_v48 = vld [vmem:[#allocation8 + $0x15c] ss:$24 sps:$4 sm:$0xff]  }
 0x123   :  { %2967 = vmatprep.subr.bf16.mxu1 %v4760_v52  ;;  %3004 = vmatprep.subr.bf16.mxu0 %v4763_v53  ;;  %v4614_v61 = vpop.f32.mrf.mxu0  ;;  %v4821_v50 = vld [vmem:[#allocation8 + $0xae0] ss:$24 sps:$4 sm:$0xff]   ;;  %v237_v52 = vmax.f32 %v212_v45, 0.0  ;;  %v4826_v53 = vld [vmem:[#allocation8 + $0xab4] ss:$24 sps:$4 sm:$0xff]  }
 0x124   :  { %v240_v62 = vmax.f32 %v223_v58, 0.0  ;;  %v4832_v58 = vld [vmem:[#allocation8 + $0xa84] ss:$24 sps:$4 sm:$0xff]   ;;  %v4830_v61 = vld [vmem:[#allocation8 + $0xa80] ss:$24 sps:$4 sm:$0xff]  }
 0x125   :  { %v227_v63 = vpop.f32.mrf.mxu0  ;;  %v4895_v45 = vld [vmem:[#allocation8 + $0x3cc] ss:$24 sps:$4 sm:$0xff]  }
 0x126   :  { %2968 = vmatpush1.bf16.msra.mxu1 %v4758_v56  ;;  %3005 = vmatpush1.bf16.msra.mxu0 %v4761_v57  ;;  %v5588_v2 = vpack.c.bf16 %v240_v62, %v240_v62  ;;  %v5591_v3 = vadd.f32 %v5561_v9, %v227_v63  ;;  %v4824_v56 = vld [vmem:[#allocation8 + $0xab0] ss:$24 sps:$4 sm:$0xff]   ;;  %v5598_v57 = vpack.c.bf16 %v237_v52, %v237_v52  ;;  %v4833_v62 = vld [vmem:[#allocation8 + $0xd20] ss:$24 sps:$4 sm:$0xff]   ;;  %v4838_v9 = vld [vmem:[#allocation8 + $0xcf4] ss:$24 sps:$4 sm:$0xff]  }
 0x127   :  { %2969 = vmatprep.subr.bf16.mxu1 %v4766_v59  ;;  %3006 = vmatprep.subr.bf16.mxu0 %v4769_v60  ;;  %v4617_v6 = vpop.f32.mrf.mxu0  ;;  %v4835_v59 = vld [vmem:[#allocation8 + $0xd24] ss:$24 sps:$4 sm:$0xff]   ;;  %v239_v60 = vmax.f32 %v220_v55, 0.0  ;;  %v5473_v63 = vmov 0   ;;  %v4896_v52 = vld [vmem:[#allocation8 + $0x278] ss:$24 sps:$4 sm:$0xff]  }
 0x128   :  { %3030 = vmatprep.mubr.bf16.mxu0 %v5588_v2  ;;  %v4847_v6 = vld [vmem:[#allocation8 + $0x12c] ss:$24 sps:$4 sm:$0xff]  }
 0x129   :  { %v230_v7 = vpop.f32.mrf.mxu0  ;;  %v4907_v55 = vld [vmem:[#allocation8 + $0x36c] ss:$24 sps:$4 sm:$0xff]  }
 0x12a   :  { %2970 = vmatpush1.bf16.msra.mxu1 %v4764_v0  ;;  %3007 = vmatpush1.bf16.msra.mxu0 %v4767_v1  ;;  %v5602_v0 = vpack.c.bf16 %v239_v60, %v239_v60  ;;  %v4836_v1 = vld [vmem:[#allocation8 + $0xcf0] ss:$24 sps:$4 sm:$0xff]   ;;  %v4842_v7 = vld [vmem:[#allocation8 + $0xcc0] ss:$24 sps:$4 sm:$0xff]  }
 0x12b   :  { %2971 = vmatprep.subr.bf16.mxu1 %v4772_v4  ;;  %3008 = vmatprep.subr.bf16.mxu0 %v4775_v5  ;;  %v4618_v13 = vpop.f32.mrf.mxu0  ;;  %v4839_v4 = vld [vmem:[#allocation8 + $0x158] ss:$24 sps:$4 sm:$0xff]   ;;  %v4844_v5 = vld [vmem:[#allocation8 + $0xcc4] ss:$24 sps:$4 sm:$0xff]  }
 0x12c   :  { %v4851_v13 = vld [vmem:[#allocation8 + $0xf8] ss:$24 sps:$4 sm:$0xff]  }
 0x12d   :  { %v4908_v60 = vld [vmem:[#allocation8 + $0x218] ss:$24 sps:$4 sm:$0xff]  }
 0x12e   :  { %2972 = vmatpush1.bf16.msra.mxu1 %v4770_v8  ;;  %3009 = vmatpush1.bf16.msra.mxu0 %v4773_v10  ;;  %v4845_v8 = vld [vmem:[#allocation8 + $0x128] ss:$24 sps:$4 sm:$0xff]   ;;  %v4850_v10 = vld [vmem:[#allocation8 + $0xc94] ss:$24 sps:$4 sm:$0xff]  }
 0x12f   :  { %2973 = vmatprep.subr.bf16.mxu1 %v4778_v11  ;;  %3010 = vmatprep.subr.bf16.mxu0 %v4781_v12  ;;  %v4853_v11 = vld [vmem:[#allocation8 + $0xfc] ss:$24 sps:$4 sm:$0xff]   ;;  %v4848_v12 = vld [vmem:[#allocation8 + $0xc90] ss:$24 sps:$4 sm:$0xff]  }
 0x132   :  { %2974 = vmatpush2.bf16.msra.mxu1 %v4776_v14  ;;  %3011 = vmatpush1.bf16.msra.mxu0 %v4779_v15  ;;  %v4856_v14 = vld [vmem:[#allocation8 + $0xc64] ss:$24 sps:$4 sm:$0xff]  }
 0x133   :  { %2975 = vmatprep.subr.bf16.mxu1 %v4784_v16  ;;  %3012 = vmatprep.subr.bf16.mxu0 %v4787_v17  ;;  %v4859_v15 = vld [vmem:[#allocation8 + $0xcc] ss:$24 sps:$4 sm:$0xff]   ;;  %v4854_v16 = vld [vmem:[#allocation8 + $0xc60] ss:$24 sps:$4 sm:$0xff]  }
 0x134   :  { %v4857_v17 = vld [vmem:[#allocation8 + $0xc8] ss:$24 sps:$4 sm:$0xff]  }
 0x136   :  { %2976 = vmatpush2.bf16.msra.mxu1 %v4782_v18  ;;  %3013 = vmatpush1.bf16.msra.mxu0 %v4785_v20  ;;  %v4862_v18 = vld [vmem:[#allocation8 + $0xc34] ss:$24 sps:$4 sm:$0xff]  }
 0x137   :  { %2977 = vmatprep.subr.bf16.mxu1 %v4790_v21  ;;  %3014 = vmatprep.subr.bf16.mxu0 %v4793_v23  ;;  %v4865_v20 = vld [vmem:[#allocation8 + $0x9c] ss:$24 sps:$4 sm:$0xff]   ;;  %v4860_v21 = vld [vmem:[#allocation8 + $0xc30] ss:$24 sps:$4 sm:$0xff]  }
 0x138   :  { %v4863_v23 = vld [vmem:[#allocation8 + $0x98] ss:$24 sps:$4 sm:$0xff]  }
 0x13a   :  { %2978 = vmatpush2.bf16.msra.mxu1 %v4788_v24  ;;  %3015 = vmatpush2.bf16.msra.mxu0 %v4791_v25  ;;  %v4868_v24 = vld [vmem:[#allocation8 + $0xc04] ss:$24 sps:$4 sm:$0xff]  }
 0x13b   :  { %2979 = vmatprep.subr.bf16.mxu1 %v4796_v26  ;;  %3016 = vmatprep.subr.bf16.mxu0 %v4799_v27  ;;  %v4871_v25 = vld [vmem:[#allocation8 + $0x6c] ss:$24 sps:$4 sm:$0xff]   ;;  %v241_v26 = vmax.f32 %v5591_v3, 0.0  ;;  %v4866_v27 = vld [vmem:[#allocation8 + $0xc00] ss:$24 sps:$4 sm:$0xff]  }
 0x13c   :  { %v4878_v3 = vld [vmem:[#allocation8 + $0x8] ss:$24 sps:$4 sm:$0xff]  }
 0x13e   :  { %2980 = vmatpush2.bf16.msra.mxu1 %v4794_v28  ;;  %3017 = vmatpush2.bf16.msra.mxu0 %v4797_v29  ;;  %v4869_v28 = vld [vmem:[#allocation8 + $0x68] ss:$24 sps:$4 sm:$0xff]   ;;  %v4874_v29 = vld [vmem:[#allocation8 + $0x3c] ss:$24 sps:$4 sm:$0xff]  }
 0x13f   :  { %2981 = vmatprep.subr.bf16.mxu1 %v4802_v30  ;;  %3018 = vmatprep.subr.bf16.mxu0 %v4805_v31  ;;  %v4877_v30 = vld [vmem:[#allocation8 + $0x45c] ss:$24 sps:$4 sm:$0xff]   ;;  %v5607_v31 = vpack.c.bf16 %v241_v26, %v241_v26  ;;  %v4947_v26 = vld [vmem:[#allocation8 + $0x6f8] ss:$24 sps:$4 sm:$0xff]  }
 0x142   :  { %2982 = vmatpush2.bf16.msra.mxu1 %v4800_v32  ;;  %3019 = vmatpush2.bf16.msra.mxu0 %v4803_v33  ;;  %v4872_v32 = vld [vmem:[#allocation8 + $0x38] ss:$24 sps:$4 sm:$0xff]  }
 0x143   :  { %2983 = vmatprep.subr.bf16.mxu1 %v4808_v37  ;;  %3020 = vmatprep.subr.bf16.mxu0 %v4811_v38  ;;  %v4875_v33 = vld [vmem:[#allocation8 + $0x458] ss:$24 sps:$4 sm:$0xff]   ;;  %v4880_v37 = vld [vmem:[#allocation8 + $0xc] ss:$24 sps:$4 sm:$0xff]  }
 0x144   :  { %v4883_v38 = vld [vmem:[#allocation8 + $0x42c] ss:$24 sps:$4 sm:$0xff]  }
 0x146   :  { %2984 = vmatpush2.bf16.msra.mxu1 %v4806_v39  ;;  %3021 = vmatpush2.bf16.msra.mxu0 %v4809_v40  ;;  %v4881_v39 = vld [vmem:[#allocation8 + $0x428] ss:$24 sps:$4 sm:$0xff]   ;;  %v4886_v40 = vld [vmem:[#allocation8 + $0x2dc] ss:$24 sps:$4 sm:$0xff]  }
 0x147   :  { %2985 = vmatprep.subr.bf16.mxu1 %v4814_v41  ;;  %3022 = vmatprep.subr.bf16.mxu0 %v4817_v42  ;;  %v4889_v41 = vld [vmem:[#allocation8 + $0x3fc] ss:$24 sps:$4 sm:$0xff]   ;;  %v4884_v42 = vld [vmem:[#allocation8 + $0x2d8] ss:$24 sps:$4 sm:$0xff]  }
 0x14a   :  { %2986 = vmatpush2.bf16.msra.mxu1 %v4812_v43  ;;  %3023 = vmatpush2.bf16.msra.mxu0 %v4815_v44  ;;  %v4887_v43 = vld [vmem:[#allocation8 + $0x3f8] ss:$24 sps:$4 sm:$0xff]   ;;  %v4892_v44 = vld [vmem:[#allocation8 + $0x2ac] ss:$24 sps:$4 sm:$0xff]  }
 0x14b   :  { %2987 = vmatprep.subr.bf16.mxu1 %v4820_v46  ;;  %3024 = vmatprep.subr.bf16.mxu0 %v4823_v47  ;;  %v4890_v46 = vld [vmem:[#allocation8 + $0x2a8] ss:$24 sps:$4 sm:$0xff]  }
 0x14c   :  { %v4893_v47 = vld [vmem:[#allocation8 + $0x3c8] ss:$24 sps:$4 sm:$0xff]  }
 0x14e   :  { %2988 = vmatpush2.bf16.msra.mxu1 %v4818_v49  ;;  %3025 = vmatpush2.bf16.msra.mxu0 %v4821_v50  ;;  %v4898_v49 = vld [vmem:[#allocation8 + $0x27c] ss:$24 sps:$4 sm:$0xff]  }
 0x14f   :  { %3026 = vmatprep.subr.bf16.mxu0 %v4826_v53  ;;  %3039 = vmatprep.subr.bf16.mxu1 %v4829_v54  ;;  %v4901_v50 = vld [vmem:[#allocation8 + $0x39c] ss:$24 sps:$4 sm:$0xff]   ;;  %v4899_v53 = vld [vmem:[#allocation8 + $0x398] ss:$24 sps:$4 sm:$0xff]   ;;  %v4904_v54 = vld [vmem:[#allocation8 + $0x24c] ss:$24 sps:$4 sm:$0xff]  }
 0x151   :  { %2990 = vmatmul.mubr.bf16.vlgmr.msra.gmra.mxu1 %v5598_v57 }
 0x152   :  { %3027 = vmatpush2.bf16.msra.mxu0 %v4824_v56  ;;  %3040 = vmatpush1.bf16.msra.mxu1 %v4827_v35  ;;  %v4902_v56 = vld [vmem:[#allocation8 + $0x248] ss:$24 sps:$4 sm:$0xff]  }
 0x153   :  { %3028 = vmatprep.subr.bf16.mxu0 %v4832_v58  ;;  %3041 = vmatprep.subr.bf16.mxu1 %v4835_v59  ;;  %v4905_v35 = vld [vmem:[#allocation8 + $0x368] ss:$24 sps:$4 sm:$0xff]   ;;  %v4910_v58 = vld [vmem:[#allocation8 + $0x21c] ss:$24 sps:$4 sm:$0xff]  }
 0x154   :  { %3071 = vmatprep.mubr.bf16.mxu1 %v5473_v63  ;;  %v4913_v59 = vld [vmem:[#allocation8 + $0x33c] ss:$24 sps:$4 sm:$0xff]  }
 0x156   :  { %3029 = vmatpush2.bf16.msra.mxu0 %v4830_v61  ;;  %3042 = vmatpush1.bf16.msra.mxu1 %v4833_v62  ;;  %v4911_v61 = vld [vmem:[#allocation8 + $0x338] ss:$24 sps:$4 sm:$0xff]   ;;  %v4916_v62 = vld [vmem:[#allocation8 + $0x1ec] ss:$24 sps:$4 sm:$0xff]  }
 0x157   :  { %3043 = vmatprep.subr.bf16.mxu1 %v4838_v9  ;;  %3080 = vmatprep.subr.bf16.mxu0 %v4841_v48  ;;  %v4919_v9 = vld [vmem:[#allocation8 + $0x30c] ss:$24 sps:$4 sm:$0xff]   ;;  %v4914_v48 = vld [vmem:[#allocation8 + $0x1e8] ss:$24 sps:$4 sm:$0xff]  }
 0x159   :  { %3031 = vmatmul.mubr.bf16.vlgmr.msra.gmra.mxu0 %v5602_v0 }
 0x15a   :  { %3044 = vmatpush1.bf16.msra.mxu1 %v4836_v1  ;;  %3081 = vmatpush1.bf16.msra.mxu0 %v4839_v4  ;;  %v4917_v1 = vld [vmem:[#allocation8 + $0x308] ss:$24 sps:$4 sm:$0xff]   ;;  %v4922_v4 = vld [vmem:[#allocation8 + $0x1bc] ss:$24 sps:$4 sm:$0xff]  }
 0x15b   :  { %3112 = vmatprep.mubr.bf16.mxu0 %v5565_v19  ;;  %3045 = vmatprep.subr.bf16.mxu1 %v4844_v5  ;;  %v4925_v5 = vld [vmem:[#allocation8 + $0x5dc] ss:$24 sps:$4 sm:$0xff]  }
 0x15c   :  { %3082 = vmatprep.subr.bf16.mxu0 %v4847_v6  ;;  %v4920_v6 = vld [vmem:[#allocation8 + $0x1b8] ss:$24 sps:$4 sm:$0xff]  }
 0x15e   :  { %3046 = vmatpush1.bf16.msra.mxu1 %v4842_v7  ;;  %3083 = vmatpush1.bf16.msra.mxu0 %v4845_v8  ;;  %v4923_v7 = vld [vmem:[#allocation8 + $0x5d8] ss:$24 sps:$4 sm:$0xff]   ;;  %v4928_v8 = vld [vmem:[#allocation8 + $0x18c] ss:$24 sps:$4 sm:$0xff]  }
 0x15f   :  { %3047 = vmatprep.subr.bf16.mxu1 %v4850_v10  ;;  %3084 = vmatprep.subr.bf16.mxu0 %v4853_v11  ;;  %v4931_v10 = vld [vmem:[#allocation8 + $0x5ac] ss:$24 sps:$4 sm:$0xff]   ;;  %v4926_v11 = vld [vmem:[#allocation8 + $0x188] ss:$24 sps:$4 sm:$0xff]  }
 0x162   :  { %3048 = vmatpush1.bf16.msra.mxu1 %v4848_v12  ;;  %3085 = vmatpush1.bf16.msra.mxu0 %v4851_v13  ;;  %v4929_v12 = vld [vmem:[#allocation8 + $0x5a8] ss:$24 sps:$4 sm:$0xff]   ;;  %v4934_v13 = vld [vmem:[#allocation8 + $0x57c] ss:$24 sps:$4 sm:$0xff]  }
 0x163   :  { %3049 = vmatprep.subr.bf16.mxu1 %v4856_v14  ;;  %3086 = vmatprep.subr.bf16.mxu0 %v4859_v15  ;;  %v4937_v14 = vld [vmem:[#allocation8 + $0x75c] ss:$24 sps:$4 sm:$0xff]   ;;  %v4932_v15 = vld [vmem:[#allocation8 + $0x578] ss:$24 sps:$4 sm:$0xff]  }
 0x166   :  { %3050 = vmatpush1.bf16.msra.mxu1 %v4854_v16  ;;  %3087 = vmatpush1.bf16.msra.mxu0 %v4857_v17  ;;  %v4935_v16 = vld [vmem:[#allocation8 + $0x758] ss:$24 sps:$4 sm:$0xff]   ;;  %v4940_v17 = vld [vmem:[#allocation8 + $0x54c] ss:$24 sps:$4 sm:$0xff]  }
 0x167   :  { %3051 = vmatprep.subr.bf16.mxu1 %v4862_v18  ;;  %3088 = vmatprep.subr.bf16.mxu0 %v4865_v20  ;;  %v4943_v18 = vld [vmem:[#allocation8 + $0x72c] ss:$24 sps:$4 sm:$0xff]   ;;  %v4938_v20 = vld [vmem:[#allocation8 + $0x548] ss:$24 sps:$4 sm:$0xff]  }
 0x16a   :  { %3052 = vmatpush1.bf16.msra.mxu1 %v4860_v21  ;;  %3089 = vmatpush1.bf16.msra.mxu0 %v4863_v23  ;;  %v4941_v21 = vld [vmem:[#allocation8 + $0x728] ss:$24 sps:$4 sm:$0xff]   ;;  %v4946_v23 = vld [vmem:[#allocation8 + $0x51c] ss:$24 sps:$4 sm:$0xff]  }
 0x16b   :  { %3053 = vmatprep.subr.bf16.mxu1 %v4868_v24  ;;  %3090 = vmatprep.subr.bf16.mxu0 %v4871_v25  ;;  %v4949_v24 = vld [vmem:[#allocation8 + $0x6fc] ss:$24 sps:$4 sm:$0xff]   ;;  %v4944_v25 = vld [vmem:[#allocation8 + $0x518] ss:$24 sps:$4 sm:$0xff]  }
 0x16e   :  { %3054 = vmatpush1.bf16.msra.mxu1 %v4866_v27  ;;  %3091 = vmatpush1.bf16.msra.mxu0 %v4869_v28  ;;  %v4952_v27 = vld [vmem:[#allocation8 + $0x4ec] ss:$24 sps:$4 sm:$0xff]  }
 0x16f   :  { %3092 = vmatprep.subr.bf16.mxu0 %v4874_v29  ;;  %3121 = vmatprep.subr.bf16.mxu1 %v4877_v30  ;;  %v4955_v28 = vld [vmem:[#allocation8 + $0x6cc] ss:$24 sps:$4 sm:$0xff]   ;;  %v4950_v29 = vld [vmem:[#allocation8 + $0x4e8] ss:$24 sps:$4 sm:$0xff]  }
 0x170   :  { %v4953_v30 = vld [vmem:[#allocation8 + $0x6c8] ss:$24 sps:$4 sm:$0xff]  }
 0x171   :  { %3072 = vmatmul.mubr.bf16.vlgmr.msra.gmra.mxu1 %v5607_v31 }
 0x172   :  { %3093 = vmatpush1.bf16.msra.mxu0 %v4872_v32  ;;  %3122 = vmatpush1.bf16.msra.mxu1 %v4875_v33  ;;  %v4958_v32 = vld [vmem:[#allocation8 + $0x4bc] ss:$24 sps:$4 sm:$0xff]  }
 0x173   :  { %3153 = vmatprep.mubr.bf16.mxu1 %v5577_v36  ;;  %3094 = vmatprep.subr.bf16.mxu0 %v4880_v37  ;;  %v4961_v33 = vld [vmem:[#allocation8 + $0x69c] ss:$24 sps:$4 sm:$0xff]   ;;  %v4956_v37 = vld [vmem:[#allocation8 + $0x4b8] ss:$24 sps:$4 sm:$0xff]  }
 0x174   :  { %3123 = vmatprep.subr.bf16.mxu1 %v4883_v38  ;;  %v4959_v38 = vld [vmem:[#allocation8 + $0x698] ss:$24 sps:$4 sm:$0xff]  }
 0x176   :  { %3095 = vmatpush1.bf16.msra.mxu0 %v4878_v3  ;;  %3124 = vmatpush1.bf16.msra.mxu1 %v4881_v39  ;;  %v4964_v3 = vld [vmem:[#allocation8 + $0x48c] ss:$24 sps:$4 sm:$0xff]  }
 0x177   :  { %3096 = vmatprep.subr.bf16.mxu0 %v4886_v40  ;;  %3125 = vmatprep.subr.bf16.mxu1 %v4889_v41  ;;  %v4967_v39 = vld [vmem:[#allocation8 + $0x66c] ss:$24 sps:$4 sm:$0xff]   ;;  %v4962_v40 = vld [vmem:[#allocation8 + $0x488] ss:$24 sps:$4 sm:$0xff]  }
 0x178   :  { %v4965_v41 = vld [vmem:[#allocation8 + $0x668] ss:$24 sps:$4 sm:$0xff]  }
 0x17a   :  { %3097 = vmatpush2.bf16.msra.mxu0 %v4884_v42  ;;  %3126 = vmatpush1.bf16.msra.mxu1 %v4887_v43  ;;  %v4970_v42 = vld [vmem:[#allocation8 + $0x63c] ss:$24 sps:$4 sm:$0xff]  }
 0x17b   :  { %3098 = vmatprep.subr.bf16.mxu0 %v4892_v44  ;;  %3127 = vmatprep.subr.bf16.mxu1 %v4895_v45  ;;  %v4973_v43 = vld [vmem:[#allocation8 + $0xa5c] ss:$24 sps:$4 sm:$0xff]   ;;  %v4968_v44 = vld [vmem:[#allocation8 + $0x638] ss:$24 sps:$4 sm:$0xff]  }
 0x17c   :  { %v4971_v45 = vld [vmem:[#allocation8 + $0xa58] ss:$24 sps:$4 sm:$0xff]  }
 0x17e   :  { %3099 = vmatpush2.bf16.msra.mxu0 %v4890_v46  ;;  %3128 = vmatpush1.bf16.msra.mxu1 %v4893_v47  ;;  %v4976_v46 = vld [vmem:[#allocation8 + $0x60c] ss:$24 sps:$4 sm:$0xff]  }
 0x17f   :  { %3100 = vmatprep.subr.bf16.mxu0 %v4898_v49  ;;  %3129 = vmatprep.subr.bf16.mxu1 %v4901_v50  ;;  %v4979_v47 = vld [vmem:[#allocation8 + $0xa2c] ss:$24 sps:$4 sm:$0xff]   ;;  %v4974_v49 = vld [vmem:[#allocation8 + $0x608] ss:$24 sps:$4 sm:$0xff]  }
 0x180   :  { %v4977_v50 = vld [vmem:[#allocation8 + $0xa28] ss:$24 sps:$4 sm:$0xff]  }
 0x182   :  { %3101 = vmatpush2.bf16.msra.mxu0 %v4896_v52  ;;  %3130 = vmatpush1.bf16.msra.mxu1 %v4899_v53  ;;  %v4982_v52 = vld [vmem:[#allocation8 + $0x8dc] ss:$24 sps:$4 sm:$0xff]  }
 0x183   :  { %3102 = vmatprep.subr.bf16.mxu0 %v4904_v54  ;;  %3131 = vmatprep.subr.bf16.mxu1 %v4907_v55  ;;  %v4985_v53 = vld [vmem:[#allocation8 + $0x9fc] ss:$24 sps:$4 sm:$0xff]   ;;  %v4980_v54 = vld [vmem:[#allocation8 + $0x8d8] ss:$24 sps:$4 sm:$0xff]  }
 0x184   :  { %v4983_v55 = vld [vmem:[#allocation8 + $0x9f8] ss:$24 sps:$4 sm:$0xff]  }
 0x186   :  { %3103 = vmatpush2.bf16.msra.mxu0 %v4902_v56  ;;  %3132 = vmatpush1.bf16.msra.mxu1 %v4905_v35  ;;  %v4988_v56 = vld [vmem:[#allocation8 + $0x8ac] ss:$24 sps:$4 sm:$0xff]  }
 0x187   :  { %3104 = vmatprep.subr.bf16.mxu0 %v4910_v58  ;;  %3133 = vmatprep.subr.bf16.mxu1 %v4913_v59  ;;  %v4991_v35 = vld [vmem:[#allocation8 + $0x9cc] ss:$24 sps:$4 sm:$0xff]   ;;  %v4986_v58 = vld [vmem:[#allocation8 + $0x8a8] ss:$24 sps:$4 sm:$0xff]  }
 0x188   :  { %v4989_v59 = vld [vmem:[#allocation8 + $0x9c8] ss:$24 sps:$4 sm:$0xff]  }
 0x18a   :  { %3105 = vmatpush2.bf16.msra.mxu0 %v4908_v60  ;;  %3134 = vmatpush1.bf16.msra.mxu1 %v4911_v61  ;;  %v4994_v60 = vld [vmem:[#allocation8 + $0x87c] ss:$24 sps:$4 sm:$0xff]  }
 0x18b   :  { %3106 = vmatprep.subr.bf16.mxu0 %v4916_v62  ;;  %3135 = vmatprep.subr.bf16.mxu1 %v4919_v9  ;;  %v4997_v61 = vld [vmem:[#allocation8 + $0x99c] ss:$24 sps:$4 sm:$0xff]   ;;  %v4992_v62 = vld [vmem:[#allocation8 + $0x878] ss:$24 sps:$4 sm:$0xff]  }
 0x18c   :  { %v4995_v9 = vld [vmem:[#allocation8 + $0x998] ss:$24 sps:$4 sm:$0xff]  }
 0x18e   :  { %3107 = vmatpush2.bf16.msra.mxu0 %v4914_v48  ;;  %3136 = vmatpush1.bf16.msra.mxu1 %v4917_v1  ;;  %v5000_v48 = vld [vmem:[#allocation8 + $0x84c] ss:$24 sps:$4 sm:$0xff]  }
 0x18f   :  { %3108 = vmatprep.subr.bf16.mxu0 %v4922_v4  ;;  %3137 = vmatprep.subr.bf16.mxu1 %v4925_v5  ;;  %v5003_v1 = vld [vmem:[#allocation8 + $0x96c] ss:$24 sps:$4 sm:$0xff]   ;;  %v4998_v4 = vld [vmem:[#allocation8 + $0x848] ss:$24 sps:$4 sm:$0xff]  }
 0x190   :  { %v5001_v5 = vld [vmem:[#allocation8 + $0x968] ss:$24 sps:$4 sm:$0xff]  }
 0x192   :  { %3109 = vmatpush2.bf16.msra.mxu0 %v4920_v6  ;;  %3138 = vmatpush2.bf16.msra.mxu1 %v4923_v7  ;;  %v5006_v6 = vld [vmem:[#allocation8 + $0x81c] ss:$24 sps:$4 sm:$0xff]  }
 0x193   :  { %3110 = vmatprep.subr.bf16.mxu0 %v4928_v8  ;;  %3139 = vmatprep.subr.bf16.mxu1 %v4931_v10  ;;  %v5009_v7 = vld [vmem:[#allocation8 + $0x93c] ss:$24 sps:$4 sm:$0xff]   ;;  %v5004_v8 = vld [vmem:[#allocation8 + $0x818] ss:$24 sps:$4 sm:$0xff]  }
 0x194   :  { %v5007_v10 = vld [vmem:[#allocation8 + $0x938] ss:$24 sps:$4 sm:$0xff]  }
 0x196   :  { %3111 = vmatpush2.bf16.msra.mxu0 %v4926_v11  ;;  %3140 = vmatpush2.bf16.msra.mxu1 %v4929_v12  ;;  %v5012_v11 = vld [vmem:[#allocation8 + $0x7ec] ss:$24 sps:$4 sm:$0xff]  }
 0x197   :  { %3141 = vmatprep.subr.bf16.mxu1 %v4934_v13  ;;  %3162 = vmatprep.subr.bf16.mxu0 %v4937_v14  ;;  %v5015_v12 = vld [vmem:[#allocation8 + $0x90c] ss:$24 sps:$4 sm:$0xff]   ;;  %v685_v13 = vlaneseq  ;;  %v5010_v14 = vld [vmem:[#allocation8 + $0x7e8] ss:$24 sps:$4 sm:$0xff]  }
 0x199   :  { %3113 = vmatmul.mubr.bf16.vlgmr.msra.gmra.mxu0 %v5568_v22 }
 0x19a   :  { %3142 = vmatpush2.bf16.msra.mxu1 %v4932_v15  ;;  %3163 = vmatpush1.bf16.msra.mxu0 %v4935_v16  ;;  %v5013_v15 = vld [vmem:[#allocation8 + $0x908] ss:$24 sps:$4 sm:$0xff]   ;;  %v5018_v16 = vld [vmem:[#allocation8 + $0x7bc] ss:$24 sps:$4 sm:$0xff]  }
 0x19b   :  { %3194 = vmatprep.mubr.bf16.mxu0 %v5584_v51  ;;  %3143 = vmatprep.subr.bf16.mxu1 %v4940_v17  ;;  %v5021_v17 = vld [vmem:[#allocation8 + $0xbdc] ss:$24 sps:$4 sm:$0xff]  }
 0x19c   :  { %3164 = vmatprep.subr.bf16.mxu0 %v4943_v18  ;;  %v5615_v18 = vshrl.u32 %v685_v13, 7  ;;  %v5069_v13 = vld [vmem:[#allocation8 + $0x164] ss:$24 sps:$4 sm:$0xff]  }
 0x19e   :  { %3144 = vmatpush2.bf16.msra.mxu1 %v4938_v20  ;;  %3165 = vmatpush1.bf16.msra.mxu0 %v4941_v21  ;;  %v5016_v20 = vld [vmem:[#allocation8 + $0x7b8] ss:$24 sps:$4 sm:$0xff]  }
 0x19f   :  { %3145 = vmatprep.subr.bf16.mxu1 %v4946_v23  ;;  %3166 = vmatprep.subr.bf16.mxu0 %v4949_v24  ;;  %v5019_v21 = vld [vmem:[#allocation8 + $0xbd8] ss:$24 sps:$4 sm:$0xff]   ;;  %v5024_v23 = vld [vmem:[#allocation8 + $0x78c] ss:$24 sps:$4 sm:$0xff]  }
 0x1a0   :  { %v5027_v24 = vld [vmem:[#allocation8 + $0xbac] ss:$24 sps:$4 sm:$0xff]  }
 0x1a2   :  { %3146 = vmatpush2.bf16.msra.mxu1 %v4944_v25  ;;  %3167 = vmatpush1.bf16.msra.mxu0 %v4947_v26  ;;  %v687_v25 = vsub.s32 0, %v5615_v18  ;;  %v5618_v26 = vld [vmem:[#allocation9] sm:$0x3f] }
 0x1a3   :  { %3147 = vmatprep.subr.bf16.mxu1 %v4952_v27  ;;  %3168 = vmatprep.subr.bf16.mxu0 %v4955_v28  ;;  %v691_v28 = vsub.s32 1, %v5615_v18 }
 0x1a6   :  { %3148 = vmatpush2.bf16.msra.mxu1 %v4950_v29  ;;  %3169 = vmatpush1.bf16.msra.mxu0 %v4953_v30  ;;  %v5022_v29 = vld [vmem:[#allocation8 + $0x788] ss:$24 sps:$4 sm:$0xff]  }
 0x1a7   :  { %3149 = vmatprep.subr.bf16.mxu1 %v4958_v32  ;;  %3170 = vmatprep.subr.bf16.mxu0 %v4961_v33  ;;  %v5025_v30 = vld [vmem:[#allocation8 + $0xba8] ss:$24 sps:$4 sm:$0xff]   ;;  %v5030_v33 = vld [vmem:[#allocation8 + $0xb7c] ss:$24 sps:$4 sm:$0xff]  }
 0x1aa   :  { %3150 = vmatpush2.bf16.msra.mxu1 %v4956_v37  ;;  %3171 = vmatpush1.bf16.msra.mxu0 %v4959_v38  ;;  %v5033_v37 = vld [vmem:[#allocation8 + $0xd5c] ss:$24 sps:$4 sm:$0xff]   ;;  %v688_v38 = vrot.slane %v5618_v26, %v687_v25  ;;  %v5076_v25 = vld [vmem:[#allocation8 + $0x100] ss:$24 sps:$4 sm:$0xff]  }
 0x1ab   :  { %3151 = vmatprep.subr.bf16.mxu1 %v4964_v3  ;;  %3172 = vmatprep.subr.bf16.mxu0 %v4967_v39  ;;  %v692_v39 = vrot.slane %v5618_v26, %v691_v28  ;;  %v5084_v28 = vld [vmem:[#allocation8 + $0xd4] ss:$24 sps:$4 sm:$0xff]  }
 0x1ae   :  { %3152 = vmatpush2.bf16.msra.mxu1 %v4962_v40  ;;  %3173 = vmatpush1.bf16.msra.mxu0 %v4965_v41  ;;  %v5028_v40 = vld [vmem:[#allocation8 + $0xb78] ss:$24 sps:$4 sm:$0xff]  }
 0x1af   :  { %3174 = vmatprep.subr.bf16.mxu0 %v4970_v42  ;;  %3203 = vmatprep.subr.bf16.mxu1 %v4973_v43  ;;  %v5031_v41 = vld [vmem:[#allocation8 + $0xd58] ss:$24 sps:$4 sm:$0xff]   ;;  %v5036_v43 = vld [vmem:[#allocation8 + $0xb4c] ss:$24 sps:$4 sm:$0xff]  }
 0x1b1   :  { %3154 = vmatmul.mubr.bf16.vlgmr.msra.gmra.mxu1 %v5573_v34 }
 0x1b2   :  { %3175 = vmatpush1.bf16.msra.mxu0 %v4968_v44  ;;  %3204 = vmatpush1.bf16.msra.mxu1 %v4971_v45  ;;  %v5039_v44 = vld [vmem:[#allocation8 + $0xd2c] ss:$24 sps:$4 sm:$0xff]  }
 0x1b3   :  { %3235 = vmatprep.mubr.bf16.mxu1 %v5588_v2  ;;  %3176 = vmatprep.subr.bf16.mxu0 %v4976_v46 }
 0x1b4   :  { %3205 = vmatprep.subr.bf16.mxu1 %v4979_v47 }
 0x1b6   :  { %3177 = vmatpush1.bf16.msra.mxu0 %v4974_v49  ;;  %3206 = vmatpush1.bf16.msra.mxu1 %v4977_v50  ;;  %v5034_v50 = vld [vmem:[#allocation8 + $0xb48] ss:$24 sps:$4 sm:$0xff]  }
 0x1b7   :  { %3178 = vmatprep.subr.bf16.mxu0 %v4982_v52  ;;  %3207 = vmatprep.subr.bf16.mxu1 %v4985_v53  ;;  %v5037_v52 = vld [vmem:[#allocation8 + $0xd28] ss:$24 sps:$4 sm:$0xff]  }
 0x1ba   :  { %3179 = vmatpush2.bf16.msra.mxu0 %v4980_v54  ;;  %3208 = vmatpush1.bf16.msra.mxu1 %v4983_v55  ;;  %v5042_v54 = vld [vmem:[#allocation8 + $0xb1c] ss:$24 sps:$4 sm:$0xff]  }
 0x1bb   :  { %3180 = vmatprep.subr.bf16.mxu0 %v4988_v56  ;;  %3209 = vmatprep.subr.bf16.mxu1 %v4991_v35  ;;  %v5045_v55 = vld [vmem:[#allocation8 + $0xcfc] ss:$24 sps:$4 sm:$0xff]  }
 0x1be   :  { %3181 = vmatpush2.bf16.msra.mxu0 %v4986_v58  ;;  %3210 = vmatpush1.bf16.msra.mxu1 %v4989_v59  ;;  %v5040_v58 = vld [vmem:[#allocation8 + $0xb18] ss:$24 sps:$4 sm:$0xff]  }
 0x1bf   :  { %3182 = vmatprep.subr.bf16.mxu0 %v4994_v60  ;;  %3211 = vmatprep.subr.bf16.mxu1 %v4997_v61  ;;  %v5043_v59 = vld [vmem:[#allocation8 + $0xcf8] ss:$24 sps:$4 sm:$0xff]   ;;  %v5048_v60 = vld [vmem:[#allocation8 + $0xaec] ss:$24 sps:$4 sm:$0xff]  }
 0x1c0   :  { %v5051_v61 = vld [vmem:[#allocation8 + $0xccc] ss:$24 sps:$4 sm:$0xff]  }
 0x1c2   :  { %3183 = vmatpush2.bf16.msra.mxu0 %v4992_v62  ;;  %3212 = vmatpush1.bf16.msra.mxu1 %v4995_v9  ;;  %v5046_v9 = vld [vmem:[#allocation8 + $0xae8] ss:$24 sps:$4 sm:$0xff]  }
 0x1c3   :  { %3184 = vmatprep.subr.bf16.mxu0 %v5000_v48  ;;  %3213 = vmatprep.subr.bf16.mxu1 %v5003_v1  ;;  %v5049_v48 = vld [vmem:[#allocation8 + $0xcc8] ss:$24 sps:$4 sm:$0xff]   ;;  %v5054_v1 = vld [vmem:[#allocation8 + $0xabc] ss:$24 sps:$4 sm:$0xff]  }
 0x1c6   :  { %3185 = vmatpush2.bf16.msra.mxu0 %v4998_v4  ;;  %3214 = vmatpush1.bf16.msra.mxu1 %v5001_v5  ;;  %v5057_v4 = vld [vmem:[#allocation8 + $0xc9c] ss:$24 sps:$4 sm:$0xff]   ;;  %v5052_v5 = vld [vmem:[#allocation8 + $0xab8] ss:$24 sps:$4 sm:$0xff]  }
 0x1c7   :  { %3186 = vmatprep.subr.bf16.mxu0 %v5006_v6  ;;  %3215 = vmatprep.subr.bf16.mxu1 %v5009_v7  ;;  %v5055_v6 = vld [vmem:[#allocation8 + $0xc98] ss:$24 sps:$4 sm:$0xff]   ;;  %v5060_v7 = vld [vmem:[#allocation8 + $0xa8c] ss:$24 sps:$4 sm:$0xff]  }
 0x1ca   :  { %3187 = vmatpush2.bf16.msra.mxu0 %v5004_v8  ;;  %3216 = vmatpush1.bf16.msra.mxu1 %v5007_v10  ;;  %v5063_v8 = vld [vmem:[#allocation8 + $0xc6c] ss:$24 sps:$4 sm:$0xff]   ;;  %v5058_v10 = vld [vmem:[#allocation8 + $0xa88] ss:$24 sps:$4 sm:$0xff]  }
 0x1cb   :  { %3188 = vmatprep.subr.bf16.mxu0 %v5012_v11  ;;  %3217 = vmatprep.subr.bf16.mxu1 %v5015_v12  ;;  %v5061_v11 = vld [vmem:[#allocation8 + $0xc68] ss:$24 sps:$4 sm:$0xff]   ;;  %v5066_v12 = vld [vmem:[#allocation8 + $0xc3c] ss:$24 sps:$4 sm:$0xff]  }
 0x1ce   :  { %3189 = vmatpush2.bf16.msra.mxu0 %v5010_v14  ;;  %3218 = vmatpush1.bf16.msra.mxu1 %v5013_v15  ;;  %v5064_v14 = vld [vmem:[#allocation8 + $0xc38] ss:$24 sps:$4 sm:$0xff]  }
 0x1cf   :  { %3190 = vmatprep.subr.bf16.mxu0 %v5018_v16  ;;  %3219 = vmatprep.subr.bf16.mxu1 %v5021_v17  ;;  %v5067_v15 = vld [vmem:[#allocation8 + $0x160] ss:$24 sps:$4 sm:$0xff]   ;;  %v5072_v16 = vld [vmem:[#allocation8 + $0xc0c] ss:$24 sps:$4 sm:$0xff]  }
 0x1d0   :  { %v5075_v17 = vld [vmem:[#allocation8 + $0x134] ss:$24 sps:$4 sm:$0xff]  }
 0x1d1   :  { %v2909_v27 = vpop.f32.mrf.mxu1 }
 0x1d2   :  { %3191 = vmatpush2.bf16.msra.mxu0 %v5016_v20  ;;  %3220 = vmatpush2.bf16.msra.mxu1 %v5019_v21  ;;  %v2910_v45 = vadd.f32 %v2909_v27, %v688_v38  ;;  %v5070_v20 = vld [vmem:[#allocation8 + $0xc08] ss:$24 sps:$4 sm:$0xff]  }
 0x1d3   :  { %v2911_v32 = vpop.f32.mrf.mxu1  ;;  %3192 = vmatprep.subr.bf16.mxu0 %v5024_v23  ;;  %3221 = vmatprep.subr.bf16.mxu1 %v5027_v24  ;;  %v5073_v21 = vld [vmem:[#allocation8 + $0x130] ss:$24 sps:$4 sm:$0xff]   ;;  %v5078_v23 = vld [vmem:[#allocation8 + $0x104] ss:$24 sps:$4 sm:$0xff]   ;;  %v5079_v27 = vld [vmem:[#allocation8 + $0x460] ss:$24 sps:$4 sm:$0xff]  }
 0x1d4   :  { %v2912_v47 = vadd.f32 %v2911_v32, %v692_v39  ;;  %v5081_v24 = vld [vmem:[#allocation8 + $0x464] ss:$24 sps:$4 sm:$0xff]   ;;  %v5085_v32 = vld [vmem:[#allocation8 + $0x430] ss:$24 sps:$4 sm:$0xff]   ;;  %v5091_v38 = vld [vmem:[#allocation8 + $0x400] ss:$24 sps:$4 sm:$0xff]  }
 0x1d5   :  { %v2913_v3 = vpop.f32.mrf.mxu1  ;;  %v5099_v39 = vld [vmem:[#allocation8 + $0x3d4] ss:$24 sps:$4 sm:$0xff]  }
 0x1d6   :  { %3193 = vmatpush2.bf16.msra.mxu0 %v5022_v29  ;;  %3222 = vmatpush2.bf16.msra.mxu1 %v5025_v30  ;;  %v5087_v29 = vld [vmem:[#allocation8 + $0x434] ss:$24 sps:$4 sm:$0xff]   ;;  %v5082_v30 = vld [vmem:[#allocation8 + $0xd0] ss:$24 sps:$4 sm:$0xff]  }
 0x1d7   :  { %v2914_v42 = vpop.f32.mrf.mxu1  ;;  %3223 = vmatprep.subr.bf16.mxu1 %v5030_v33  ;;  %3244 = vmatprep.subr.bf16.mxu0 %v5033_v37  ;;  %v5093_v33 = vld [vmem:[#allocation8 + $0x404] ss:$24 sps:$4 sm:$0xff]   ;;  %v5088_v37 = vld [vmem:[#allocation8 + $0xa0] ss:$24 sps:$4 sm:$0xff]   ;;  %v5096_v3 = vld [vmem:[#allocation8 + $0x74] ss:$24 sps:$4 sm:$0xff]  }
 0x1d8   :  { %v5102_v42 = vld [vmem:[#allocation8 + $0x44] ss:$24 sps:$4 sm:$0xff]  }
 0x1d9   :  { %3195 = vmatmul.mubr.bf16.vlgmr.msra.gmra.mxu0 %v5598_v57  ;;  %v2950_v46 = vpop.f32.mrf.mxu0 }
 0x1da   :  { %v5624_v49 = vadd.f32 %v2950_v46, %v2910_v45  ;;  %3224 = vmatpush2.bf16.msra.mxu1 %v5028_v40  ;;  %3245 = vmatpush1.bf16.msra.mxu0 %v5031_v41  ;;  %v5094_v40 = vld [vmem:[#allocation8 + $0x70] ss:$24 sps:$4 sm:$0xff]   ;;  %v5108_v45 = vld [vmem:[#allocation8 + $0x14] ss:$24 sps:$4 sm:$0xff]  }
 0x1db   :  { %v2952_v53 = vpop.f32.mrf.mxu0  ;;  %3225 = vmatprep.subr.bf16.mxu1 %v5036_v43  ;;  %3246 = vmatprep.subr.bf16.mxu0 %v5039_v44  ;;  %v5097_v41 = vld [vmem:[#allocation8 + $0x3d0] ss:$24 sps:$4 sm:$0xff]   ;;  %v5100_v43 = vld [vmem:[#allocation8 + $0x40] ss:$24 sps:$4 sm:$0xff]   ;;  %v5111_v46 = vld [vmem:[#allocation8 + $0x374] ss:$24 sps:$4 sm:$0xff]  }
 0x1dc   :  { %v5626_v56 = vadd.f32 %v2952_v53, %v2912_v47  ;;  %3276 = vmatprep.mubr.bf16.mxu0 %v5473_v63  ;;  %v5103_v44 = vld [vmem:[#allocation8 + $0x3a0] ss:$24 sps:$4 sm:$0xff]   ;;  %v5106_v47 = vld [vmem:[#allocation8 + $0x10] ss:$24 sps:$4 sm:$0xff]   ;;  %v5117_v53 = vld [vmem:[#allocation8 + $0x344] ss:$24 sps:$4 sm:$0xff]  }
 0x1dd   :  { %v2954_v35 = vpop.f32.mrf.mxu0 }
 0x1de   :  { %3226 = vmatpush2.bf16.msra.mxu1 %v5034_v50  ;;  %3247 = vmatpush1.bf16.msra.mxu0 %v5037_v52  ;;  %v5109_v50 = vld [vmem:[#allocation8 + $0x370] ss:$24 sps:$4 sm:$0xff]   ;;  %v5114_v52 = vld [vmem:[#allocation8 + $0x2e4] ss:$24 sps:$4 sm:$0xff]   ;;  %v5120_v35 = vld [vmem:[#allocation8 + $0x2b4] ss:$24 sps:$4 sm:$0xff]  }
 0x1df   :  { %3227 = vmatprep.subr.bf16.mxu1 %v5042_v54  ;;  %3248 = vmatprep.subr.bf16.mxu0 %v5045_v55  ;;  %v2955_v62 = vpop.f32.mrf.mxu0  ;;  %v5112_v54 = vld [vmem:[#allocation8 + $0x2e0] ss:$24 sps:$4 sm:$0xff]  }
 0x1e0   :  { %v5115_v55 = vld [vmem:[#allocation8 + $0x340] ss:$24 sps:$4 sm:$0xff]   ;;  %v5121_v62 = vld [vmem:[#allocation8 + $0x310] ss:$24 sps:$4 sm:$0xff]  }
 0x1e2   :  { %3228 = vmatpush2.bf16.msra.mxu1 %v5040_v58  ;;  %3249 = vmatpush1.bf16.msra.mxu0 %v5043_v59  ;;  %v5123_v58 = vld [vmem:[#allocation8 + $0x314] ss:$24 sps:$4 sm:$0xff]  }
 0x1e3   :  { %3229 = vmatprep.subr.bf16.mxu1 %v5048_v60  ;;  %3250 = vmatprep.subr.bf16.mxu0 %v5051_v61  ;;  %v5118_v61 = vld [vmem:[#allocation8 + $0x2b0] ss:$24 sps:$4 sm:$0xff]  }
 0x1e6   :  { %3230 = vmatpush2.bf16.msra.mxu1 %v5046_v9  ;;  %3251 = vmatpush1.bf16.msra.mxu0 %v5049_v48  ;;  %v5126_v48 = vld [vmem:[#allocation8 + $0x284] ss:$24 sps:$4 sm:$0xff]  }
 0x1e7   :  { %3231 = vmatprep.subr.bf16.mxu1 %v5054_v1  ;;  %3252 = vmatprep.subr.bf16.mxu0 %v5057_v4  ;;  %v5129_v1 = vld [vmem:[#allocation8 + $0x5e4] ss:$24 sps:$4 sm:$0xff]  }
 0x1ea   :  { %3232 = vmatpush2.bf16.msra.mxu1 %v5052_v5  ;;  %3253 = vmatpush1.bf16.msra.mxu0 %v5055_v6  ;;  %v5124_v6 = vld [vmem:[#allocation8 + $0x280] ss:$24 sps:$4 sm:$0xff]  }
 0x1eb   :  { %3233 = vmatprep.subr.bf16.mxu1 %v5060_v7  ;;  %3254 = vmatprep.subr.bf16.mxu0 %v5063_v8  ;;  %v5127_v7 = vld [vmem:[#allocation8 + $0x5e0] ss:$24 sps:$4 sm:$0xff]  }
 0x1ee   :  { %3234 = vmatpush2.bf16.msra.mxu1 %v5058_v10  ;;  %3255 = vmatpush1.bf16.msra.mxu0 %v5061_v11  ;;  %v5135_v10 = vld [vmem:[#allocation8 + $0x5b4] ss:$24 sps:$4 sm:$0xff]  }
 0x1ef   :  { %3256 = vmatprep.subr.bf16.mxu0 %v5066_v12  ;;  %3285 = vmatprep.subr.bf16.mxu1 %v5069_v13  ;;  %v5130_v13 = vld [vmem:[#allocation8 + $0x250] ss:$24 sps:$4 sm:$0xff]  }
 0x1f1   :  { %3236 = vmatmul.mubr.bf16.vlgmr.msra.gmra.mxu1 %v5602_v0 }
 0x1f2   :  { %3257 = vmatpush1.bf16.msra.mxu0 %v5064_v14  ;;  %3286 = vmatpush1.bf16.msra.mxu1 %v5067_v15  ;;  %v5133_v14 = vld [vmem:[#allocation8 + $0x5b0] ss:$24 sps:$4 sm:$0xff]  }
 0x1f3   :  { %3317 = vmatprep.mubr.bf16.mxu1 %v5565_v19  ;;  %3258 = vmatprep.subr.bf16.mxu0 %v5072_v16  ;;  %v5090_v19 = vld [vmem:[#allocation8 + $0xa4] ss:$24 sps:$4 sm:$0xff]  }
 0x1f4   :  { %3287 = vmatprep.subr.bf16.mxu1 %v5075_v17  ;;  %v5141_v16 = vld [vmem:[#allocation8 + $0x584] ss:$24 sps:$4 sm:$0xff]  }
 0x1f6   :  { %3259 = vmatpush1.bf16.msra.mxu0 %v5070_v20  ;;  %3288 = vmatpush1.bf16.msra.mxu1 %v5073_v21  ;;  %v5136_v21 = vld [vmem:[#allocation8 + $0x220] ss:$24 sps:$4 sm:$0xff]  }
 0x1f7   :  { %3289 = vmatprep.subr.bf16.mxu1 %v5078_v23  ;;  %3326 = vmatprep.subr.bf16.mxu0 %v5081_v24  ;;  %v5139_v23 = vld [vmem:[#allocation8 + $0x580] ss:$24 sps:$4 sm:$0xff]   ;;  %v5144_v24 = vld [vmem:[#allocation8 + $0x1f4] ss:$24 sps:$4 sm:$0xff]  }
 0x1f9   :  { %3277 = vmatmul.mubr.bf16.vlgmr.msra.gmra.mxu0 %v5607_v31 }
 0x1fa   :  { %3290 = vmatpush1.bf16.msra.mxu1 %v5076_v25  ;;  %3327 = vmatpush1.bf16.msra.mxu0 %v5079_v27  ;;  %v5147_v25 = vld [vmem:[#allocation8 + $0x554] ss:$24 sps:$4 sm:$0xff]  }
 0x1fb   :  { %3358 = vmatprep.mubr.bf16.mxu0 %v5577_v36  ;;  %3291 = vmatprep.subr.bf16.mxu1 %v5084_v28  ;;  %v5105_v36 = vld [vmem:[#allocation8 + $0x3a4] ss:$24 sps:$4 sm:$0xff]   ;;  %v5142_v28 = vld [vmem:[#allocation8 + $0x1f0] ss:$24 sps:$4 sm:$0xff]  }
 0x1fc   :  { %3328 = vmatprep.subr.bf16.mxu0 %v5087_v29  ;;  %v5145_v29 = vld [vmem:[#allocation8 + $0x550] ss:$24 sps:$4 sm:$0xff]  }
 0x1fe   :  { %3292 = vmatpush1.bf16.msra.mxu1 %v5082_v30  ;;  %3329 = vmatpush1.bf16.msra.mxu0 %v5085_v32  ;;  %v5150_v30 = vld [vmem:[#allocation8 + $0x1c4] ss:$24 sps:$4 sm:$0xff]  }
 0x1ff   :  { %3293 = vmatprep.subr.bf16.mxu1 %v5090_v19  ;;  %3330 = vmatprep.subr.bf16.mxu0 %v5093_v33  ;;  %v5153_v32 = vld [vmem:[#allocation8 + $0x524] ss:$24 sps:$4 sm:$0xff]   ;;  %v5148_v19 = vld [vmem:[#allocation8 + $0x1c0] ss:$24 sps:$4 sm:$0xff]  }
 0x200   :  { %v5151_v33 = vld [vmem:[#allocation8 + $0x520] ss:$24 sps:$4 sm:$0xff]  }
 0x202   :  { %3294 = vmatpush1.bf16.msra.mxu1 %v5088_v37  ;;  %3331 = vmatpush1.bf16.msra.mxu0 %v5091_v38  ;;  %v5156_v37 = vld [vmem:[#allocation8 + $0x194] ss:$24 sps:$4 sm:$0xff]  }
 0x203   :  { %3295 = vmatprep.subr.bf16.mxu1 %v5096_v3  ;;  %3332 = vmatprep.subr.bf16.mxu0 %v5099_v39  ;;  %v5159_v38 = vld [vmem:[#allocation8 + $0x4f4] ss:$24 sps:$4 sm:$0xff]   ;;  %v5154_v3 = vld [vmem:[#allocation8 + $0x190] ss:$24 sps:$4 sm:$0xff]  }
 0x204   :  { %v5157_v39 = vld [vmem:[#allocation8 + $0x4f0] ss:$24 sps:$4 sm:$0xff]  }
 0x206   :  { %3296 = vmatpush1.bf16.msra.mxu1 %v5094_v40  ;;  %3333 = vmatpush1.bf16.msra.mxu0 %v5097_v41  ;;  %v5162_v40 = vld [vmem:[#allocation8 + $0x4c4] ss:$24 sps:$4 sm:$0xff]  }
 0x207   :  { %3297 = vmatprep.subr.bf16.mxu1 %v5102_v42  ;;  %3334 = vmatprep.subr.bf16.mxu0 %v5105_v36  ;;  %v5165_v41 = vld [vmem:[#allocation8 + $0x764] ss:$24 sps:$4 sm:$0xff]   ;;  %v5160_v42 = vld [vmem:[#allocation8 + $0x4c0] ss:$24 sps:$4 sm:$0xff]  }
 0x208   :  { %v5163_v36 = vld [vmem:[#allocation8 + $0x760] ss:$24 sps:$4 sm:$0xff]  }
 0x20a   :  { %3298 = vmatpush1.bf16.msra.mxu1 %v5100_v43  ;;  %3335 = vmatpush1.bf16.msra.mxu0 %v5103_v44  ;;  %v5168_v43 = vld [vmem:[#allocation8 + $0x494] ss:$24 sps:$4 sm:$0xff]  }
 0x20b   :  { %3299 = vmatprep.subr.bf16.mxu1 %v5108_v45  ;;  %3336 = vmatprep.subr.bf16.mxu0 %v5111_v46  ;;  %v5171_v44 = vld [vmem:[#allocation8 + $0x734] ss:$24 sps:$4 sm:$0xff]  }
 0x20e   :  { %3300 = vmatpush1.bf16.msra.mxu1 %v5106_v47  ;;  %3337 = vmatpush1.bf16.msra.mxu0 %v5109_v50  ;;  %v5166_v47 = vld [vmem:[#allocation8 + $0x490] ss:$24 sps:$4 sm:$0xff]  }
 0x20f   :  { %3301 = vmatprep.subr.bf16.mxu1 %v5114_v52  ;;  %3338 = vmatprep.subr.bf16.mxu0 %v5117_v53  ;;  %v5169_v50 = vld [vmem:[#allocation8 + $0x730] ss:$24 sps:$4 sm:$0xff]   ;;  %v5174_v53 = vld [vmem:[#allocation8 + $0x704] ss:$24 sps:$4 sm:$0xff]  }
 0x211   :  { %v2991_v59 = vpop.f32.mrf.mxu1 }
 0x212   :  { %v2992_v60 = vadd.f32 %v2991_v59, %v5624_v49  ;;  %3302 = vmatpush2.bf16.msra.mxu1 %v5112_v54  ;;  %3339 = vmatpush1.bf16.msra.mxu0 %v5115_v55  ;;  %v5132_v49 = vld [vmem:[#allocation8 + $0x254] ss:$24 sps:$4 sm:$0xff]   ;;  %v5177_v54 = vld [vmem:[#allocation8 + $0xa64] ss:$24 sps:$4 sm:$0xff]  }
 0x213   :  { %v2993_v9 = vpop.f32.mrf.mxu1  ;;  %3303 = vmatprep.subr.bf16.mxu1 %v5120_v35  ;;  %3340 = vmatprep.subr.bf16.mxu0 %v5123_v58 }
 0x214   :  { %v2994_v4 = vadd.f32 %v2993_v9, %v5626_v56  ;;  %v5138_v56 = vld [vmem:[#allocation8 + $0x224] ss:$24 sps:$4 sm:$0xff]   ;;  %v5180_v9 = vld [vmem:[#allocation8 + $0x6d4] ss:$24 sps:$4 sm:$0xff]  }
 0x215   :  { %v2995_v5 = vpop.f32.mrf.mxu1 }
 0x216   :  { %3304 = vmatpush2.bf16.msra.mxu1 %v5118_v61  ;;  %3341 = vmatpush1.bf16.msra.mxu0 %v5121_v62  ;;  %v5175_v61 = vld [vmem:[#allocation8 + $0xa60] ss:$24 sps:$4 sm:$0xff]   ;;  %v5186_v5 = vld [vmem:[#allocation8 + $0x6a4] ss:$24 sps:$4 sm:$0xff]  }
 0x217   :  { %v2996_v8 = vpop.f32.mrf.mxu1  ;;  %3305 = vmatprep.subr.bf16.mxu1 %v5126_v48  ;;  %3342 = vmatprep.subr.bf16.mxu0 %v5129_v1  ;;  %v5183_v48 = vld [vmem:[#allocation8 + $0xa34] ss:$24 sps:$4 sm:$0xff]   ;;  %v5178_v1 = vld [vmem:[#allocation8 + $0x6d0] ss:$24 sps:$4 sm:$0xff]  }
 0x218   :  { %v5187_v8 = vld [vmem:[#allocation8 + $0xa00] ss:$24 sps:$4 sm:$0xff]  }
 0x219   :  { %v3032_v11 = vpop.f32.mrf.mxu0 }
 0x21a   :  { %v3033_v12 = vadd.f32 %v3032_v11, %v2992_v60  ;;  %3306 = vmatpush2.bf16.msra.mxu1 %v5124_v6  ;;  %3343 = vmatpush2.bf16.msra.mxu0 %v5127_v7  ;;  %v5189_v6 = vld [vmem:[#allocation8 + $0xa04] ss:$24 sps:$4 sm:$0xff]   ;;  %v5184_v7 = vld [vmem:[#allocation8 + $0x6a0] ss:$24 sps:$4 sm:$0xff]   ;;  %v5193_v11 = vld [vmem:[#allocation8 + $0x9d0] ss:$24 sps:$4 sm:$0xff]  }
 0x21b   :  { %v3034_v15 = vpop.f32.mrf.mxu0  ;;  %3307 = vmatprep.subr.bf16.mxu1 %v5132_v49  ;;  %3344 = vmatprep.subr.bf16.mxu0 %v5135_v10  ;;  %v5192_v49 = vld [vmem:[#allocation8 + $0x674] ss:$24 sps:$4 sm:$0xff]  }
 0x21c   :  { %v3035_v17 = vadd.f32 %v3034_v15, %v2994_v4  ;;  %v5181_v4 = vld [vmem:[#allocation8 + $0xa30] ss:$24 sps:$4 sm:$0xff]   ;;  %v5195_v10 = vld [vmem:[#allocation8 + $0x9d4] ss:$24 sps:$4 sm:$0xff]  }
 0x21d   :  { %v3036_v20 = vpop.f32.mrf.mxu0  ;;  %v5204_v15 = vld [vmem:[#allocation8 + $0x614] ss:$24 sps:$4 sm:$0xff]  }
 0x21e   :  { %3308 = vmatpush2.bf16.msra.mxu1 %v5130_v13  ;;  %3345 = vmatpush2.bf16.msra.mxu0 %v5133_v14  ;;  %v5196_v13 = vld [vmem:[#allocation8 + $0x640] ss:$24 sps:$4 sm:$0xff]   ;;  %v5210_v20 = vld [vmem:[#allocation8 + $0x8e4] ss:$24 sps:$4 sm:$0xff]  }
 0x21f   :  { %3309 = vmatprep.subr.bf16.mxu1 %v5138_v56  ;;  %3346 = vmatprep.subr.bf16.mxu0 %v5141_v16  ;;  %v3037_v27 = vpop.f32.mrf.mxu0  ;;  %v5199_v14 = vld [vmem:[#allocation8 + $0x9a0] ss:$24 sps:$4 sm:$0xff]   ;;  %v5207_v56 = vld [vmem:[#allocation8 + $0x974] ss:$24 sps:$4 sm:$0xff]   ;;  %v5202_v16 = vld [vmem:[#allocation8 + $0x610] ss:$24 sps:$4 sm:$0xff]  }
 0x220   :  { %v5219_v27 = vld [vmem:[#allocation8 + $0x914] ss:$24 sps:$4 sm:$0xff]  }
 0x222   :  { %3310 = vmatpush2.bf16.msra.mxu1 %v5136_v21  ;;  %3347 = vmatpush2.bf16.msra.mxu0 %v5139_v23  ;;  %v5213_v21 = vld [vmem:[#allocation8 + $0x944] ss:$24 sps:$4 sm:$0xff]   ;;  %v5208_v23 = vld [vmem:[#allocation8 + $0x8e0] ss:$24 sps:$4 sm:$0xff]  }
 0x223   :  { %3311 = vmatprep.subr.bf16.mxu1 %v5144_v24  ;;  %3348 = vmatprep.subr.bf16.mxu0 %v5147_v25  ;;  %v5211_v24 = vld [vmem:[#allocation8 + $0x940] ss:$24 sps:$4 sm:$0xff]   ;;  %v5216_v25 = vld [vmem:[#allocation8 + $0x8b4] ss:$24 sps:$4 sm:$0xff]  }
 0x226   :  { %3312 = vmatpush2.bf16.msra.mxu1 %v5142_v28  ;;  %3349 = vmatpush2.bf16.msra.mxu0 %v5145_v29  ;;  %v5214_v28 = vld [vmem:[#allocation8 + $0x8b0] ss:$24 sps:$4 sm:$0xff]  }
 0x227   :  { %3313 = vmatprep.subr.bf16.mxu1 %v5150_v30  ;;  %3350 = vmatprep.subr.bf16.mxu0 %v5153_v32  ;;  %v5217_v29 = vld [vmem:[#allocation8 + $0x910] ss:$24 sps:$4 sm:$0xff]   ;;  %v5222_v30 = vld [vmem:[#allocation8 + $0x884] ss:$24 sps:$4 sm:$0xff]  }
 0x228   :  { %v5225_v32 = vld [vmem:[#allocation8 + $0xbe4] ss:$24 sps:$4 sm:$0xff]  }
 0x22a   :  { %3314 = vmatpush2.bf16.msra.mxu1 %v5148_v19  ;;  %3351 = vmatpush2.bf16.msra.mxu0 %v5151_v33  ;;  %v5220_v19 = vld [vmem:[#allocation8 + $0x880] ss:$24 sps:$4 sm:$0xff]  }
 0x22b   :  { %3315 = vmatprep.subr.bf16.mxu1 %v5156_v37  ;;  %3352 = vmatprep.subr.bf16.mxu0 %v5159_v38  ;;  %v5223_v33 = vld [vmem:[#allocation8 + $0xbe0] ss:$24 sps:$4 sm:$0xff]   ;;  %v5228_v37 = vld [vmem:[#allocation8 + $0x854] ss:$24 sps:$4 sm:$0xff]  }
 0x22c   :  { %v5231_v38 = vld [vmem:[#allocation8 + $0xbb4] ss:$24 sps:$4 sm:$0xff]  }
 0x22e   :  { %3316 = vmatpush2.bf16.msra.mxu1 %v5154_v3  ;;  %3353 = vmatpush2.bf16.msra.mxu0 %v5157_v39  ;;  %v5226_v39 = vld [vmem:[#allocation8 + $0x850] ss:$24 sps:$4 sm:$0xff]  }
 0x22f   :  { %3354 = vmatprep.subr.bf16.mxu0 %v5162_v40  ;;  %3367 = vmatprep.subr.bf16.mxu1 %v5165_v41  ;;  %v5229_v40 = vld [vmem:[#allocation8 + $0xbb0] ss:$24 sps:$4 sm:$0xff]  }
 0x231   :  { %v3073_v45 = vpop.f32.mrf.mxu1  ;;  %3318 = vmatmul.mubr.bf16.vlgmr.msra.gmra.mxu1 %v5568_v22  ;;  %v5172_v22 = vld [vmem:[#allocation8 + $0x700] ss:$24 sps:$4 sm:$0xff]  }
 0x232   :  { %v3074_v46 = vadd.f32 %v3073_v45, %v3033_v12  ;;  %3355 = vmatpush2.bf16.msra.mxu0 %v5160_v42  ;;  %3368 = vmatpush1.bf16.msra.mxu1 %v5163_v36  ;;  %v5198_v12 = vld [vmem:[#allocation8 + $0x644] ss:$24 sps:$4 sm:$0xff]   ;;  %v5235_v45 = vld [vmem:[#allocation8 + $0xb80] ss:$24 sps:$4 sm:$0xff]  }
 0x233   :  { %3399 = vmatprep.mubr.bf16.mxu1 %v5584_v51  ;;  %v3075_v52 = vpop.f32.mrf.mxu1  ;;  %3356 = vmatprep.subr.bf16.mxu0 %v5168_v43  ;;  %v5234_v42 = vld [vmem:[#allocation8 + $0x824] ss:$24 sps:$4 sm:$0xff]  }
 0x234   :  { %v3490_v55 = vmax.f32 %v3074_v46, 0.0  ;;  %v3076_v35 = vadd.f32 %v3075_v52, %v3035_v17  ;;  %3369 = vmatprep.subr.bf16.mxu1 %v5171_v44  ;;  %v5205_v17 = vld [vmem:[#allocation8 + $0x970] ss:$24 sps:$4 sm:$0xff]   ;;  %v5237_v36 = vld [vmem:[#allocation8 + $0xb84] ss:$24 sps:$4 sm:$0xff]  }
 0x235   :  { %v3077_v58 = vpop.f32.mrf.mxu1  ;;  %v5232_v44 = vld [vmem:[#allocation8 + $0x820] ss:$24 sps:$4 sm:$0xff]   ;;  %v5238_v52 = vld [vmem:[#allocation8 + $0x7f0] ss:$24 sps:$4 sm:$0xff]  }
 0x236   :  { %v5637_v59 = vpack.c.bf16 %v3490_v55, %v3490_v55  ;;  %v3491_v60 = vmax.f32 %v3076_v35, 0.0  ;;  %3357 = vmatpush2.bf16.msra.mxu0 %v5166_v47  ;;  %3370 = vmatpush1.bf16.msra.mxu1 %v5169_v50  ;;  %v5240_v47 = vld [vmem:[#allocation8 + $0x7f4] ss:$24 sps:$4 sm:$0xff]   ;;  %v5249_v55 = vld [vmem:[#allocation8 + $0xb24] ss:$24 sps:$4 sm:$0xff]  }
 0x237   :  { %v3078_v62 = vpop.f32.mrf.mxu1  ;;  %3371 = vmatprep.subr.bf16.mxu1 %v5174_v53  ;;  %3408 = vmatprep.subr.bf16.mxu0 %v5177_v54  ;;  %v5243_v50 = vld [vmem:[#allocation8 + $0xb54] ss:$24 sps:$4 sm:$0xff]   ;;  %v5241_v53 = vld [vmem:[#allocation8 + $0xb50] ss:$24 sps:$4 sm:$0xff]   ;;  %v5246_v54 = vld [vmem:[#allocation8 + $0x7c4] ss:$24 sps:$4 sm:$0xff]  }
 0x238   :  { %v5639_v51 = vpack.c.bf16 %v3491_v60, %v3491_v60  ;;  %v5244_v35 = vld [vmem:[#allocation8 + $0x7c0] ss:$24 sps:$4 sm:$0xff]   ;;  %v5252_v60 = vld [vmem:[#allocation8 + $0x794] ss:$24 sps:$4 sm:$0xff]   ;;  %v699_v62 = vsub.s32 3, %v5615_v18 }
 0x239   :  { %3359 = vmatmul.mubr.bf16.vlgmr.msra.gmra.mxu0 %v5573_v34  ;;  %v5190_v34 = vld [vmem:[#allocation8 + $0x670] ss:$24 sps:$4 sm:$0xff]   ;;  %v5247_v58 = vld [vmem:[#allocation8 + $0xb20] ss:$24 sps:$4 sm:$0xff]  }
 0x23a   :  { %3372 = vmatpush1.bf16.msra.mxu1 %v5172_v22  ;;  %3409 = vmatpush1.bf16.msra.mxu0 %v5175_v61  ;;  %v5255_v22 = vld [vmem:[#allocation8 + $0xaf4] ss:$24 sps:$4 sm:$0xff]   ;;  %v695_v61 = vsub.s32 2, %v5615_v18 }
 0x23b   :  { %3440 = vmatprep.mubr.bf16.mxu0 %v5588_v2  ;;  %3373 = vmatprep.subr.bf16.mxu1 %v5180_v9  ;;  %v5201_v2 = vld [vmem:[#allocation8 + $0x9a4] ss:$24 sps:$4 sm:$0xff]   ;;  %v5250_v9 = vld [vmem:[#allocation8 + $0x790] ss:$24 sps:$4 sm:$0xff]  }
 0x23c   :  { %3410 = vmatprep.subr.bf16.mxu0 %v5183_v48  ;;  %v5253_v48 = vld [vmem:[#allocation8 + $0xaf0] ss:$24 sps:$4 sm:$0xff]  }
 0x23e   :  { %3374 = vmatpush1.bf16.msra.mxu1 %v5178_v1  ;;  %3411 = vmatpush1.bf16.msra.mxu0 %v5181_v4  ;;  %v5258_v1 = vld [vmem:[#allocation8 + $0xac4] ss:$24 sps:$4 sm:$0xff]  }
 0x23f   :  { %3375 = vmatprep.subr.bf16.mxu1 %v5186_v5  ;;  %3412 = vmatprep.subr.bf16.mxu0 %v5189_v6  ;;  %v5261_v4 = vld [vmem:[#allocation8 + $0xd64] ss:$24 sps:$4 sm:$0xff]   ;;  %v696_v5 = vrot.slane %v5618_v26, %v695_v61  ;;  %v700_v6 = vrot.slane %v5618_v26, %v699_v62 }
 0x242   :  { %3376 = vmatpush1.bf16.msra.mxu1 %v5184_v7  ;;  %3413 = vmatpush1.bf16.msra.mxu0 %v5187_v8  ;;  %v5256_v7 = vld [vmem:[#allocation8 + $0xac0] ss:$24 sps:$4 sm:$0xff]  }
 0x243   :  { %3377 = vmatprep.subr.bf16.mxu1 %v5192_v49  ;;  %3414 = vmatprep.subr.bf16.mxu0 %v5195_v10  ;;  %v5259_v8 = vld [vmem:[#allocation8 + $0xd60] ss:$24 sps:$4 sm:$0xff]   ;;  %v5264_v49 = vld [vmem:[#allocation8 + $0xa94] ss:$24 sps:$4 sm:$0xff]  }
 0x244   :  { %v5267_v10 = vld [vmem:[#allocation8 + $0xd34] ss:$24 sps:$4 sm:$0xff]  }
 0x246   :  { %3378 = vmatpush1.bf16.msra.mxu1 %v5190_v34  ;;  %3415 = vmatpush1.bf16.msra.mxu0 %v5193_v11 }
 0x247   :  { %3379 = vmatprep.subr.bf16.mxu1 %v5198_v12  ;;  %3416 = vmatprep.subr.bf16.mxu0 %v5201_v2 }
 0x24a   :  { %3380 = vmatpush1.bf16.msra.mxu1 %v5196_v13  ;;  %3417 = vmatpush1.bf16.msra.mxu0 %v5199_v14  ;;  %v5262_v13 = vld [vmem:[#allocation8 + $0xa90] ss:$24 sps:$4 sm:$0xff]  }
 0x24b   :  { %3381 = vmatprep.subr.bf16.mxu1 %v5204_v15  ;;  %3418 = vmatprep.subr.bf16.mxu0 %v5207_v56  ;;  %v5265_v14 = vld [vmem:[#allocation8 + $0xd30] ss:$24 sps:$4 sm:$0xff]   ;;  %v5270_v56 = vld [vmem:[#allocation8 + $0xd04] ss:$24 sps:$4 sm:$0xff]  }
 0x24e   :  { %3382 = vmatpush1.bf16.msra.mxu1 %v5202_v16  ;;  %3419 = vmatpush1.bf16.msra.mxu0 %v5205_v17 }
 0x24f   :  { %3383 = vmatprep.subr.bf16.mxu1 %v5210_v20  ;;  %3420 = vmatprep.subr.bf16.mxu0 %v5213_v21  ;;  %v5268_v20 = vld [vmem:[#allocation8 + $0xd00] ss:$24 sps:$4 sm:$0xff]  }
 0x252   :  { %3384 = vmatpush2.bf16.msra.mxu1 %v5208_v23  ;;  %3421 = vmatpush1.bf16.msra.mxu0 %v5211_v24  ;;  %v5271_v23 = vld [vmem:[#allocation8 + $0xcd0] ss:$24 sps:$4 sm:$0xff]   ;;  %v5276_v24 = vld [vmem:[#allocation8 + $0xca4] ss:$24 sps:$4 sm:$0xff]  }
 0x253   :  { %3385 = vmatprep.subr.bf16.mxu1 %v5216_v25  ;;  %3422 = vmatprep.subr.bf16.mxu0 %v5219_v27  ;;  %v5274_v25 = vld [vmem:[#allocation8 + $0xca0] ss:$24 sps:$4 sm:$0xff]   ;;  %v5279_v27 = vld [vmem:[#allocation8 + $0xc74] ss:$24 sps:$4 sm:$0xff]  }
 0x256   :  { %3386 = vmatpush2.bf16.msra.mxu1 %v5214_v28  ;;  %3423 = vmatpush1.bf16.msra.mxu0 %v5217_v29  ;;  %v5277_v28 = vld [vmem:[#allocation8 + $0xc70] ss:$24 sps:$4 sm:$0xff]   ;;  %v5280_v29 = vld [vmem:[#allocation8 + $0xc40] ss:$24 sps:$4 sm:$0xff]  }
 0x257   :  { %3387 = vmatprep.subr.bf16.mxu1 %v5222_v30  ;;  %3424 = vmatprep.subr.bf16.mxu0 %v5225_v32  ;;  %v5285_v30 = vld [vmem:[#allocation8 + $0xc14] ss:$24 sps:$4 sm:$0xff]   ;;  %v5283_v32 = vld [vmem:[#allocation8 + $0xc10] ss:$24 sps:$4 sm:$0xff]  }
 0x259   :  { %v3114_v3 = vpop.f32.mrf.mxu0 }
 0x25a   :  { %3388 = vmatpush2.bf16.msra.mxu1 %v5220_v19  ;;  %3425 = vmatpush2.bf16.msra.mxu0 %v5223_v33  ;;  %v3115_v34 = vadd.f32 %v3114_v3, %v696_v5 }
 0x25b   :  { %v3116_v41 = vpop.f32.mrf.mxu0  ;;  %3389 = vmatprep.subr.bf16.mxu1 %v5228_v37  ;;  %3426 = vmatprep.subr.bf16.mxu0 %v5231_v38 }
 0x25c   :  { %v3117_v12 = vadd.f32 %v3116_v41, %v700_v6 }
 0x25d   :  { %v3118_v43 = vpop.f32.mrf.mxu0 }
 0x25e   :  { %3390 = vmatpush2.bf16.msra.mxu1 %v5226_v39  ;;  %3427 = vmatpush2.bf16.msra.mxu0 %v5229_v40 }
 0x25f   :  { %v3119_v46 = vpop.f32.mrf.mxu0  ;;  %3391 = vmatprep.subr.bf16.mxu1 %v5234_v42  ;;  %3428 = vmatprep.subr.bf16.mxu0 %v5237_v36 }
 0x262   :  { %3392 = vmatpush2.bf16.msra.mxu1 %v5232_v44  ;;  %3429 = vmatpush2.bf16.msra.mxu0 %v5235_v45 }
 0x263   :  { %3393 = vmatprep.subr.bf16.mxu1 %v5240_v47  ;;  %3430 = vmatprep.subr.bf16.mxu0 %v5243_v50 }
 0x266   :  { %3394 = vmatpush2.bf16.msra.mxu1 %v5238_v52  ;;  %3431 = vmatpush2.bf16.msra.mxu0 %v5241_v53 }
 0x267   :  { %3395 = vmatprep.subr.bf16.mxu1 %v5246_v54  ;;  %3432 = vmatprep.subr.bf16.mxu0 %v5249_v55 }
 0x26a   :  { %3396 = vmatpush2.bf16.msra.mxu1 %v5244_v35  ;;  %3433 = vmatpush2.bf16.msra.mxu0 %v5247_v58 }
 0x26b   :  { %3397 = vmatprep.subr.bf16.mxu1 %v5252_v60  ;;  %3434 = vmatprep.subr.bf16.mxu0 %v5255_v22 }
 0x26e   :  { %3398 = vmatpush2.bf16.msra.mxu1 %v5250_v9  ;;  %3435 = vmatpush2.bf16.msra.mxu0 %v5253_v48 }
 0x26f   :  { %3436 = vmatprep.subr.bf16.mxu0 %v5258_v1  ;;  %3449 = vmatprep.subr.bf16.mxu1 %v5261_v4 }
 0x271   :  { %v3155_v11 = vpop.f32.mrf.mxu1  ;;  %3400 = vmatmul.mubr.bf16.vlgmr.msra.gmra.mxu1 %v5598_v57  ;;  %v5273_v57 = vld [vmem:[#allocation8 + $0xcd4] ss:$24 sps:$4 sm:$0xff]  }
 0x272   :  { %v3156_v2 = vadd.f32 %v3155_v11, %v3115_v34  ;;  %3437 = vmatpush2.bf16.msra.mxu0 %v5256_v7  ;;  %3450 = vmatpush1.bf16.msra.mxu1 %v5259_v8 }
 0x273   :  { %v3157_v15 = vpop.f32.mrf.mxu1  ;;  %3438 = vmatprep.subr.bf16.mxu0 %v5264_v49  ;;  %3451 = vmatprep.subr.bf16.mxu1 %v5267_v10 }
 0x274   :  { %v3158_v16 = vadd.f32 %v3157_v15, %v3117_v12  ;;  %3481 = vmatprep.mubr.bf16.mxu1 %v5473_v63  ;;  %v5282_v63 = vld [vmem:[#allocation8 + $0xc44] ss:$24 sps:$4 sm:$0xff]  }
 0x275   :  { %v3159_v17 = vpop.f32.mrf.mxu1 }
 0x276   :  { %3439 = vmatpush2.bf16.msra.mxu0 %v5262_v13  ;;  %3452 = vmatpush1.bf16.msra.mxu1 %v5265_v14 }
 0x277   :  { %v3160_v21 = vpop.f32.mrf.mxu1  ;;  %3453 = vmatprep.subr.bf16.mxu1 %v5270_v56 }
 0x279   :  { %3441 = vmatmul.mubr.bf16.vlgmr.msra.gmra.mxu0 %v5602_v0 }
 0x27a   :  { %3454 = vmatpush1.bf16.msra.mxu1 %v5268_v20 }
 0x27b   :  { %3455 = vmatprep.subr.bf16.mxu1 %v5273_v57 }
 0x27e   :  { %3456 = vmatpush1.bf16.msra.mxu1 %v5271_v23 }
 0x27f   :  { %3457 = vmatprep.subr.bf16.mxu1 %v5276_v24 }
 0x282   :  { %3458 = vmatpush1.bf16.msra.mxu1 %v5274_v25 }
 0x283   :  { %3459 = vmatprep.subr.bf16.mxu1 %v5279_v27 }
 0x286   :  { %3460 = vmatpush1.bf16.msra.mxu1 %v5277_v28 }
 0x287   :  { %3461 = vmatprep.subr.bf16.mxu1 %v5282_v63 }
 0x28a   :  { %3462 = vmatpush1.bf16.msra.mxu1 %v5280_v29 }
 0x28b   :  { %3463 = vmatprep.subr.bf16.mxu1 %v5285_v30 }
 0x28e   :  { %3464 = vmatpush1.bf16.msra.mxu1 %v5283_v32 }
 0x291   :  { %3482 = vmatmul.mubr.bf16.vlgmr.msra.gmra.mxu1 %v5607_v31 }
 0x299   :  { %v3196_v0 = vpop.f32.mrf.mxu0 }
 0x29a   :  { %v3197_v19 = vadd.f32 %v3196_v0, %v3156_v2 }
 0x29b   :  { %v3198_v33 = vpop.f32.mrf.mxu0 }
 0x29c   :  { %v3199_v37 = vadd.f32 %v3198_v33, %v3158_v16 }
 0x29d   :  { %v3200_v38 = vpop.f32.mrf.mxu0 }
 0x29f   :  { %v3201_v3 = vpop.f32.mrf.mxu0 }
 0x2b1   :  { %v3237_v39 = vpop.f32.mrf.mxu1 }
 0x2b2   :  { %v3238_v40 = vadd.f32 %v3237_v39, %v3197_v19 }
 0x2b3   :  { %v3239_v41 = vpop.f32.mrf.mxu1 }
 0x2b4   :  { %v3240_v42 = vadd.f32 %v3239_v41, %v3199_v37 }
 0x2b5   :  { %v3241_v36 = vpop.f32.mrf.mxu1 }
 0x2b7   :  { %v3242_v43 = vpop.f32.mrf.mxu1 }
 0x2b9   :  { %v3278_v44 = vpop.f32.mrf.mxu0 }
 0x2ba   :  { %v3279_v45 = vadd.f32 %v3278_v44, %v3238_v40 }
 0x2bb   :  { %v3280_v46 = vpop.f32.mrf.mxu0 }
 0x2bc   :  { %v3492_v47 = vmax.f32 %v3279_v45, 0.0  ;;  %v3281_v50 = vadd.f32 %v3280_v46, %v3240_v42 }
 0x2bd   :  { %v3282_v52 = vpop.f32.mrf.mxu0 }
 0x2be   :  { %v5651_v53 = vpack.c.bf16 %v3492_v47, %v3492_v47  ;;  %v3493_v31 = vmax.f32 %v3281_v50, 0.0 }
 0x2bf   :  { %v3283_v54 = vpop.f32.mrf.mxu0 }
 0x2c0   :  { %v3499_v55 = vpack.c.bf16 %v3493_v31, %v3493_v31 }
 0x2c1   :  { %5453 = shalt.err (!%p5450_p1)  }
 0x2c2   :  { %97 = dma.hbm_to_vmem [thread:$0]  %s5677_s5, 6144, %s95_s14, [#allocation3]  ;;  %v703_v35 = vsub.s32 4, %v5615_v18  ;;  %v707_v60 = vsub.s32 5, %v5615_v18 }
 0x2c4   :  { %v704_v61 = vrot.slane %v5618_v26, %v703_v35  ;;  %v708_v9 = vrot.slane %v5618_v26, %v707_v60 }
 0x2f1   :  { %v3319_v58 = vpop.f32.mrf.mxu1 }
 0x2f2   :  { %v3320_v1 = vadd.f32 %v3319_v58, %v704_v61 }
 0x2f3   :  { %v3321_v22 = vpop.f32.mrf.mxu1 }
 0x2f4   :  { %v3322_v5 = vadd.f32 %v3321_v22, %v708_v9 }
 0x2f5   :  { %v3323_v62 = vpop.f32.mrf.mxu1 }
 0x2f7   :  { %v3324_v48 = vpop.f32.mrf.mxu1 }
 0x2f9   :  { %v3360_v4 = vpop.f32.mrf.mxu0 }
 0x2fa   :  { %v3361_v6 = vadd.f32 %v3360_v4, %v3320_v1 }
 0x2fb   :  { %v3362_v7 = vpop.f32.mrf.mxu0 }
 0x2fc   :  { %v3363_v8 = vadd.f32 %v3362_v7, %v3322_v5 }
 0x2fd   :  { %v3364_v49 = vpop.f32.mrf.mxu0 }
 0x2ff   :  { %v3365_v10 = vpop.f32.mrf.mxu0 }
 0x331   :  { %v3401_v34 = vpop.f32.mrf.mxu1 }
 0x332   :  { %v3402_v56 = vadd.f32 %v3401_v34, %v3361_v6 }
 0x333   :  { %v3403_v11 = vpop.f32.mrf.mxu1 }
 0x334   :  { %v3404_v16 = vadd.f32 %v3403_v11, %v3363_v8 }
 0x335   :  { %v3405_v12 = vpop.f32.mrf.mxu1 }
 0x337   :  { %v3406_v2 = vpop.f32.mrf.mxu1 }
 0x339   :  { %v3442_v18 = vpop.f32.mrf.mxu0 }
 0x33a   :  { %v3443_v26 = vadd.f32 %v3442_v18, %v3402_v56 }
 0x33b   :  { %v3444_v13 = vpop.f32.mrf.mxu0 }
 0x33c   :  { %v3445_v20 = vadd.f32 %v3444_v13, %v3404_v16 }
 0x33d   :  { %v3446_v14 = vpop.f32.mrf.mxu0 }
 0x33f   :  { %v3447_v15 = vpop.f32.mrf.mxu0 }
 0x351   :  { %v3483_v17 = vpop.f32.mrf.mxu1 }
 0x352   :  { %v3484_v21 = vadd.f32 %v3483_v17, %v3443_v26 }
 0x353   :  { %v3485_v57 = vpop.f32.mrf.mxu1 }
 0x354   :  { %v3494_v23 = vmax.f32 %v3484_v21, 0.0  ;;  %v3486_v24 = vadd.f32 %v3485_v57, %v3445_v20 }
 0x355   :  { %v3487_v25 = vpop.f32.mrf.mxu1 }
 0x356   :  { %v5660_v27 = vpack.c.bf16 %v3494_v23, %v3494_v23  ;;  %v3495_v28 = vmax.f32 %v3486_v24, 0.0 }
 0x357   :  { %v3488_v63 = vpop.f32.mrf.mxu1 }
 0x358   :  { %v5662_v29 = vpack.c.bf16 %v3495_v28, %v3495_v28 }
 0x359   :  { %5460 = dma.done.wait [#allocation3], 6144 }
 0x35a   :  { %5461 = vsyncadd [#allocation3], 4294961152  ;;  %3929 = vmatprep.mubr.bf16.mxu0 %v5639_v51  ;;  %3969 = vmatprep.mubr.bf16.mxu1 %v3499_v55  ;;  %v5286_v30 = vld [vmem:[#allocation2 + $0x78] sm:$0xff]   ;;  %v5290_v33 = vld [vmem:[#allocation2 + $0x70] sm:$0xff]  }
 0x35b   :  { %v5287_v32 = vld [vmem:[#allocation2 + $0x38] sm:$0xff]   ;;  %4531 = vmatprep.subr.bf16.mxu0 %v5286_v30  ;;  %v5291_v37 = vld [vmem:[#allocation2 + $0x30] sm:$0xff]   ;;  %v5294_v39 = vld [vmem:[#allocation2 + $0x68] sm:$0xff]  }
 0x35c   :  { %v5288_v0 = vld [vmem:[#allocation2 + $0xf8] sm:$0xff]   ;;  %4532 = vmatpush3.bf16.msra.mxu0 %v5287_v32  ;;  %v5292_v38 = vld [vmem:[#allocation2 + $0xf0] sm:$0xff]   ;;  %v5295_v40 = vld [vmem:[#allocation2 + $0x28] sm:$0xff]  }
 0x35d   :  { %v5289_v19 = vld [vmem:[#allocation2 + $0xb8] sm:$0xff]   ;;  %4553 = vmatprep.subr.bf16.mxu1 %v5288_v0  ;;  %4533 = vmatprep.subr.bf16.mxu0 %v5290_v33  ;;  %v5293_v3 = vld [vmem:[#allocation2 + $0xb0] sm:$0xff]   ;;  %v5296_v51 = vld [vmem:[#allocation2 + $0xe8] sm:$0xff]  }
 0x35e   :  { %4554 = vmatpush3.bf16.msra.mxu1 %v5289_v19  ;;  %v5297_v41 = vld [vmem:[#allocation2 + $0xa8] sm:$0xff]   ;;  %v5298_v42 = vld [vmem:[#allocation2 + $0x60] sm:$0xff]   ;;  %v5302_v45 = vld [vmem:[#allocation2 + $0x58] sm:$0xff]  }
 0x35f   :  { %4555 = vmatprep.subr.bf16.mxu1 %v5292_v38  ;;  %v5299_v36 = vld [vmem:[#allocation2 + $0x20] sm:$0xff]   ;;  %v5303_v46 = vld [vmem:[#allocation2 + $0x18] sm:$0xff]   ;;  %v5306_v52 = vld [vmem:[#allocation2 + $0x50] sm:$0xff]  }
 0x360   :  { %4534 = vmatpush3.bf16.msra.mxu0 %v5291_v37  ;;  %v5300_v43 = vld [vmem:[#allocation2 + $0xe0] sm:$0xff]   ;;  %v5304_v47 = vld [vmem:[#allocation2 + $0xd8] sm:$0xff]   ;;  %v5307_v31 = vld [vmem:[#allocation2 + $0x10] sm:$0xff]  }
 0x361   :  { %4535 = vmatprep.subr.bf16.mxu0 %v5294_v39  ;;  %v5301_v44 = vld [vmem:[#allocation2 + $0xa0] sm:$0xff]   ;;  %v5305_v50 = vld [vmem:[#allocation2 + $0x98] sm:$0xff]   ;;  %v5308_v54 = vld [vmem:[#allocation2 + $0xd0] sm:$0xff]  }
 0x362   :  { %4556 = vmatpush3.bf16.msra.mxu1 %v5293_v3  ;;  %v5309_v55 = vld [vmem:[#allocation2 + $0x90] sm:$0xff]   ;;  %v5310_v35 = vld [vmem:[#allocation2 + $0x48] sm:$0xff]   ;;  %v5314_v61 = vld [vmem:[#allocation2 + $0x40] sm:$0xff]  }
 0x363   :  { %4557 = vmatprep.subr.bf16.mxu1 %v5296_v51  ;;  %v5311_v58 = vld [vmem:[#allocation2 + $0x8] sm:$0xff]   ;;  %v5315_v62 = vld [vmem:[#allocation2] sm:$0xff]   ;;  %v5318_v1 = vld [vmem:[#allocation2 + $0x178] sm:$0xff]  }
 0x364   :  { %4536 = vmatpush3.bf16.msra.mxu0 %v5295_v40  ;;  %v5312_v60 = vld [vmem:[#allocation2 + $0xc8] sm:$0xff]   ;;  %v5316_v9 = vld [vmem:[#allocation2 + $0xc0] sm:$0xff]   ;;  %v5319_v4 = vld [vmem:[#allocation2 + $0x138] sm:$0xff]  }
 0x365   :  { %4537 = vmatprep.subr.bf16.mxu0 %v5298_v42  ;;  %v5313_v22 = vld [vmem:[#allocation2 + $0x88] sm:$0xff]   ;;  %v5317_v48 = vld [vmem:[#allocation2 + $0x80] sm:$0xff]   ;;  %v5320_v5 = vld [vmem:[#allocation2 + $0x170] sm:$0xff]  }
 0x366   :  { %4558 = vmatpush3.bf16.msra.mxu1 %v5297_v41  ;;  %v5321_v6 = vld [vmem:[#allocation2 + $0x130] sm:$0xff]   ;;  %v5322_v7 = vld [vmem:[#allocation2 + $0x168] sm:$0xff]   ;;  %v5324_v49 = vld [vmem:[#allocation2 + $0x160] sm:$0xff]  }
 0x367   :  { %4559 = vmatprep.subr.bf16.mxu1 %v5300_v43  ;;  %v5323_v8 = vld [vmem:[#allocation2 + $0x128] sm:$0xff]   ;;  %v5325_v10 = vld [vmem:[#allocation2 + $0x120] sm:$0xff]   ;;  %v5326_v34 = vld [vmem:[#allocation2 + $0x158] sm:$0xff]  }
 0x368   :  { %4538 = vmatpush3.bf16.msra.mxu0 %v5299_v36  ;;  %v5328_v11 = vld [vmem:[#allocation2 + $0x150] sm:$0xff]   ;;  %v5330_v2 = vld [vmem:[#allocation2 + $0x148] sm:$0xff]   ;;  %v5332_v18 = vld [vmem:[#allocation2 + $0x140] sm:$0xff]  }
 0x369   :  { %4539 = vmatprep.subr.bf16.mxu0 %v5302_v45  ;;  %v5329_v12 = vld [vmem:[#allocation2 + $0x110] sm:$0xff]   ;;  %v5333_v13 = vld [vmem:[#allocation2 + $0x100] sm:$0xff]  }
 0x36a   :  { %4560 = vmatpush3.bf16.msra.mxu1 %v5301_v44  ;;  %v4475_v23 = vld [vmem:[#allocation11] ss:$0 sm:$0xff] }
 0x36b   :  { %4561 = vmatprep.subr.bf16.mxu1 %v5304_v47 }
 0x36c   :  { %4540 = vmatpush3.bf16.msra.mxu0 %v5303_v46 }
 0x36d   :  { %4541 = vmatprep.subr.bf16.mxu0 %v5306_v52 }
 0x36e   :  { %4562 = vmatpush3.bf16.msra.mxu1 %v5305_v50 }
 0x36f   :  { %4563 = vmatprep.subr.bf16.mxu1 %v5308_v54 }
 0x370   :  { %4542 = vmatpush3.bf16.msra.mxu0 %v5307_v31 }
 0x371   :  { %4543 = vmatprep.subr.bf16.mxu0 %v5310_v35 }
 0x372   :  { %4564 = vmatpush3.bf16.msra.mxu1 %v5309_v55 }
 0x373   :  { %4565 = vmatprep.subr.bf16.mxu1 %v5312_v60 }
 0x374   :  { %4544 = vmatpush3.bf16.msra.mxu0 %v5311_v58 }
 0x375   :  { %4545 = vmatprep.subr.bf16.mxu0 %v5314_v61 }
 0x376   :  { %4566 = vmatpush3.bf16.msra.mxu1 %v5313_v22 }
 0x377   :  { %4567 = vmatprep.subr.bf16.mxu1 %v5316_v9 }
 0x378   :  { %4546 = vmatpush3.bf16.msra.mxu0 %v5315_v62 }
 0x379   :  { %4575 = vmatprep.subr.bf16.mxu0 %v5318_v1 }
 0x37a   :  { %4568 = vmatpush3.bf16.msra.mxu1 %v5317_v48 }
 0x37b   :  { %3930 = vmatmul.mubr.bf16.vlgmr.msra.gmra.mxu0 %v5637_v59  ;;  %v5327_v59 = vld [vmem:[#allocation2 + $0x118] sm:$0xff]  }
 0x37c   :  { %4576 = vmatpush3.bf16.msra.mxu0 %v5319_v4  ;;  %4009 = vmatprep.mubr.bf16.mxu0 %v5662_v29 }
 0x37d   :  { %3970 = vmatmul.mubr.bf16.vlgmr.msra.gmra.mxu1 %v5651_v53  ;;  %4577 = vmatprep.subr.bf16.mxu0 %v5320_v5  ;;  %v5331_v53 = vld [vmem:[#allocation2 + $0x108] sm:$0xff]  }
 0x380   :  { %4578 = vmatpush3.bf16.msra.mxu0 %v5321_v6 }
 0x381   :  { %4579 = vmatprep.subr.bf16.mxu0 %v5322_v7 }
 0x384   :  { %4580 = vmatpush3.bf16.msra.mxu0 %v5323_v8 }
 0x385   :  { %4581 = vmatprep.subr.bf16.mxu0 %v5324_v49 }
 0x388   :  { %4582 = vmatpush3.bf16.msra.mxu0 %v5325_v10 }
 0x389   :  { %4583 = vmatprep.subr.bf16.mxu0 %v5326_v34 }
 0x38c   :  { %4584 = vmatpush3.bf16.msra.mxu0 %v5327_v59 }
 0x38d   :  { %4585 = vmatprep.subr.bf16.mxu0 %v5328_v11 }
 0x390   :  { %4586 = vmatpush3.bf16.msra.mxu0 %v5329_v12 }
 0x391   :  { %4587 = vmatprep.subr.bf16.mxu0 %v5330_v2 }
 0x394   :  { %4588 = vmatpush3.bf16.msra.mxu0 %v5331_v53 }
 0x395   :  { %4589 = vmatprep.subr.bf16.mxu0 %v5332_v18 }
 0x398   :  { %4590 = vmatpush3.bf16.msra.mxu0 %v5333_v13 }
 0x39b   :  { %4010 = vmatmul.mubr.bf16.vlgmr.msra.gmra.mxu0 %v5660_v27 }
 0x43b   :  { %v4547_v14 = vpop.f32.mrf.mxu0 }
 0x43d   :  { %v4548_v15 = vpop.f32.mrf.mxu0  ;;  %v4569_v56 = vpop.f32.mrf.mxu1 }
 0x43e   :  { %v4549_v57 = vadd.f32 %v4548_v15, %v4547_v14 }
 0x43f   :  { %v4550_v16 = vpop.f32.mrf.mxu0  ;;  %v4570_v26 = vpop.f32.mrf.mxu1 }
 0x440   :  { %v3932_v24 = vadd.f32 %v4549_v57, %v4475_v23  ;;  %v4571_v25 = vadd.f32 %v4570_v26, %v4569_v56 }
 0x441   :  { %v4551_v17 = vpop.f32.mrf.mxu0  ;;  %v4572_v20 = vpop.f32.mrf.mxu1 }
 0x442   :  { %v3972_v29 = vadd.f32 %v4571_v25, %v3932_v24 }
 0x443   :  { %v4573_v21 = vpop.f32.mrf.mxu1 }
 0x45b   :  { %v4591_v28 = vpop.f32.mrf.mxu0 }
 0x45d   :  { %v4592_v63 = vpop.f32.mrf.mxu0 }
 0x45e   :  { %v4593_v30 = vadd.f32 %v4592_v63, %v4591_v28 }
 0x45f   :  { %v4594_v32 = vpop.f32.mrf.mxu0 }
 0x460   :  { %v4012_v0 = vadd.f32 %v4593_v30, %v3972_v29 }
 0x461   :  { %v4595_v19 = vpop.f32.mrf.mxu0 }
 0x462   :  { %4017 = vst [vmem:[%s5679_s7] sm:$0xff] %v4012_v0 }
 0x463   :  { %4022 = vsyncpa [#allocation5], 1 }
 0x464   :  { %4023 = vsyncpa [#allocation7], 1 }
 0x465   :  { %4024 = vsyncpa [#allocation10], 1 }
 0x466   :  { %4025 = vsyncmov [#allocation3] }
 0x469   :  { %s4026_s18 = vpop.sfrf %4025 }
 0x46a   :  { %p4524_p2 = scmp.ne.s32.totalorder %s4026_s18, 0 }
 0x46c   :  { %4030 = shalt.err (%p4524_p2)  }

</bundles_post_ra>
